<compile_context>
chip_gen: v5e
topology: v5e:2x2
jax: 0.10.0
libtpu: 0.0.40
codegen_flags: <defaults>
</compile_context>

<pallas_src>
import jax
import jax.numpy as jnp
import numpy as np
from jax import lax
from jax.experimental import pallas as pl
from jax.experimental.pallas import tpu as pltpu


# ---------------------------------------------------------------------------
# Fused BiLSTM + hidden2tag Pallas kernel
# ---------------------------------------------------------------------------

def _make_bilstm_kernel(T, BP, H):
    """Builds the fused kernel for static (T, BP, H)."""
    G2 = 2 * H  # width of one interleaved gate block [gate_fwd | gate_bwd]

    def kernel(x_ref,      # (T*BP, 2E)  [x_t | x_{T-1-t}], time-major, batch padded to BP
               wih_ref,    # (2E, 8H)    block-structured, direction-interleaved W_ih^T
               bih_ref,    # (1, 8H)     interleaved b_ih + b_hh for both directions
               whh_ref,    # (2H, 8H)    block-diagonal, direction-interleaved W_hh^T
               wout_ref,   # (2H, NP)    hidden2tag^T, zero padded to NP lanes
               bo_ref,     # (1, NP)     output bias (zero padded)
               o_ref,      # (T*BP, NP)  emissions (lane-dense)
               gx_s,       # VMEM (T*BP, 8H)  precomputed input gates, both dirs, step order
               hf_s,       # VMEM (T*BP, H)   forward hidden history (time order)
               hb_s):      # VMEM (T*BP, H)   backward hidden history (time order)

        # (1) Input projection for BOTH directions: one MXU matmul, off the serial path.
        #     The backward time reversal is already baked into x_ref's second feature
        #     half, so row block t of gx_s is exactly the step-t gate layout.
        # TODO(synk): at scaled E/H split this into two dense matmuls (the (2E, 8H) block
        # matrix is half structural zeros), cast MXU operands to bf16, and chunk T with a
        # grid / emit_pipeline so gx_s stays within v7x's 64 MiB VMEM.
        gx_s[...] = (jnp.dot(x_ref[...], wih_ref[...],
                             preferred_element_type=jnp.float32) + bih_ref[...])

        # (2) Serial recurrence. One fused cell covers both directions via the per-gate
        #     interleaved column layout; the carry stays packed as (BP, 2H) = [h_f | h_b],
        #     so there is no per-step concat and only 5 transcendental passes per step.
        # TODO(synk): at scaled sizes hold whh resident in the MXU across steps
        # (pltpu.matmul_push_rhs / matmul_acc_lhs / matmul_pop) and use partial unroll.
        def step(t, carry):
            h_prev, c_prev = carry                               # each (BP, 2H)
            rt = T - 1 - t
            row = pl.multiple_of(t * BP, BP)                     # sublane-aligned starts
            rrow = pl.multiple_of(rt * BP, BP)

            gh = jnp.dot(h_prev, whh_ref[...],
                         preferred_element_type=jnp.float32)     # (BP, 8H), both dirs
            gates = gx_s[pl.ds(row, BP), :] + gh                 # aligned full-width load

            # PyTorch gate order i, f, g, o; each block is [fwd(H) | bwd(H)].
            i = jax.nn.sigmoid(gates[:, 0 * G2:1 * G2])
            f = jax.nn.sigmoid(gates[:, 1 * G2:2 * G2])
            g = jnp.tanh(gates[:, 2 * G2:3 * G2])
            o = jax.nn.sigmoid(gates[:, 3 * G2:4 * G2])
            c_new = f * c_prev + i * g
            h_new = o * jnp.tanh(c_new)                          # [h_f(t) | h_b(T-1-t)]

            # Sublane-aligned, lane-offset-0 stores into the per-direction histories.
            hf_s[pl.ds(row, BP), :] = h_new[:, :H]
            hb_s[pl.ds(rrow, BP), :] = h_new[:, H:]
            return h_new, c_new

        init = (jnp.zeros((BP, 2 * H), jnp.float32),
                jnp.zeros((BP, 2 * H), jnp.float32))
        lax.fori_loop(0, T, step, init, unroll=True)

        # (3) Epilogue: hidden2tag as ONE (T*BP, 2H) x (2H, NP) matmul + bias; single
        #     lane-dense HBM store. The one-time lane concat is off the serial path.
        h_all = jnp.concatenate([hf_s[...], hb_s[...]], axis=1)
        o_ref[...] = (jnp.dot(h_all, wout_ref[...],
                              preferred_element_type=jnp.float32) + bo_ref[...])

    return kernel


# ---------------------------------------------------------------------------
# Model: parameter init + forward
# ---------------------------------------------------------------------------

def init_params(key, vocab_size, num_tags, embedding_dim, hidden_dim):
    ks = jax.random.split(key, 12)
    s = 1.0 / float(np.sqrt(hidden_dim))
    u = lambda k, shp: jax.random.uniform(k, shp, jnp.float32, -s, s)
    return {
        "embedding": jax.random.normal(ks[0], (vocab_size, embedding_dim), jnp.float32),
        # forward direction (PyTorch shapes: weight_ih (4H, E), weight_hh (4H, H))
        "w_ih_f": u(ks[1], (4 * hidden_dim, embedding_dim)),
        "w_hh_f": u(ks[2], (4 * hidden_dim, hidden_dim)),
        "b_ih_f": u(ks[3], (4 * hidden_dim,)),
        "b_hh_f": u(ks[4], (4 * hidden_dim,)),
        # backward direction
        "w_ih_b": u(ks[5], (4 * hidden_dim, embedding_dim)),
        "w_hh_b": u(ks[6], (4 * hidden_dim, hidden_dim)),
        "b_ih_b": u(ks[7], (4 * hidden_dim,)),
        "b_hh_b": u(ks[8], (4 * hidden_dim,)),
        # hidden2tag: Linear(2H -> num_tags), PyTorch weight shape (num_tags, 2H)
        "w_out": u(ks[9], (num_tags, 2 * hidden_dim)),
        "b_out": u(ks[10], (num_tags,)),
    }


def _interleave_dirs(wf, wb, H):
    """Pack fwd/bwd per-gate blocks into columns [i_f|i_b | f_f|f_b | g_f|g_b | o_f|o_b]."""
    X = wf.shape[0]
    return jnp.stack([wf.reshape(X, 4, H), wb.reshape(X, 4, H)], axis=2).reshape(X, 8 * H)


def bilstm_crf_forward(params, input_ids):
    """input_ids: (B, T) int32 -> emissions (B, T, num_tags) f32."""
    B, T = input_ids.shape
    E = params["embedding"].shape[1]
    H = params["w_hh_f"].shape[1]
    num_tags = params["w_out"].shape[0]
    NP = ((num_tags + 127) // 128) * 128     # pad tag dim to whole 128-lane vregs
    BP = ((B + 7) // 8) * 8                  # pad batch to a full sublane tile
    f32 = jnp.float32

    # Embedding gather + layout glue stay in XLA (data-dependent row gather).
    # TODO(synk): at realistic E/T move the gather into the kernel (scalar-prefetch ids +
    # DMA gather) to avoid the extra HBM round trip of x_flat.
    emb = jnp.take(params["embedding"], input_ids, axis=0)               # (B, T, E)
    x_tm = jnp.transpose(emb, (1, 0, 2)).astype(f32)                     # (T, B, E)
    x_pad = jnp.zeros((T, BP, E), f32).at[:, :B, :].set(x_tm)            # batch -> BP
    # Backward-direction time reversal baked into the feature axis: [x_t | x_{T-1-t}].
    x_pair = jnp.concatenate([x_pad, x_pad[::-1]], axis=-1)              # (T, BP, 2E)
    x_flat = x_pair.reshape(T * BP, 2 * E)

    # Input weights as a (2E, 8H) block matrix in the direction-interleaved gate layout:
    # rows 0:E feed the forward gate columns, rows E:2E feed the backward gate columns.
    zeros_e = jnp.zeros((E, 4 * H), f32)
    wih = _interleave_dirs(
        jnp.concatenate([params["w_ih_f"].T.astype(f32), zeros_e], axis=0),
        jnp.concatenate([zeros_e, params["w_ih_b"].T.astype(f32)], axis=0), H)
    bih = _interleave_dirs(
        (params["b_ih_f"] + params["b_hh_f"]).reshape(1, 4 * H).astype(f32),
        (params["b_ih_b"] + params["b_hh_b"]).reshape(1, 4 * H).astype(f32), H)

    # Block-diagonal recurrent weight with interleaved columns: one MXU matmul on the
    # packed (BP, 2H) carry produces both directions' recurrent gates.
    zeros_h = jnp.zeros((H, 4 * H), f32)
    whh = _interleave_dirs(
        jnp.concatenate([params["w_hh_f"].T.astype(f32), zeros_h], axis=0),
        jnp.concatenate([zeros_h, params["w_hh_b"].T.astype(f32)], axis=0), H)

    # hidden2tag as ONE (2H, NP) matrix (rows 0:H -> fwd, H:2H -> bwd), lane padded.
    wout = jnp.zeros((2 * H, NP), f32).at[:, :num_tags].set(params["w_out"].T.astype(f32))
    bo = jnp.zeros((1, NP), f32).at[0, :num_tags].set(params["b_out"].astype(f32))

    # TODO(synk): for real batch sizes add a leading parallel batch grid axis
    # (dimension_semantics=("parallel", ...)) so v7x's 2 TensorCores both work.
    out_flat = pl.pallas_call(
        _make_bilstm_kernel(T, BP, H),
        out_shape=jax.ShapeDtypeStruct((T * BP, NP), jnp.float32),
        scratch_shapes=[
            pltpu.VMEM((T * BP, 8 * H), jnp.float32),   # input gates, both directions
            pltpu.VMEM((T * BP, H), jnp.float32),       # forward hidden history
            pltpu.VMEM((T * BP, H), jnp.float32),       # backward hidden history
        ],
    )(x_flat, wih, bih, whh, wout, bo)

    emissions = out_flat.reshape(T, BP, NP)[:, :B, :num_tags].transpose(1, 0, 2)
    return emissions


# ---------------------------------------------------------------------------
# Pure-JAX reference (for correctness check)
# ---------------------------------------------------------------------------

def _lstm_ref(x_tm, w_ih, w_hh, b_ih, b_hh):
    H = w_hh.shape[1]
    B = x_tm.shape[1]

    def step(carry, x_t):
        h, c = carry
        gates = x_t @ w_ih.T + h @ w_hh.T + b_ih + b_hh
        i = jax.nn.sigmoid(gates[:, :H])
        f = jax.nn.sigmoid(gates[:, H:2 * H])
        g = jnp.tanh(gates[:, 2 * H:3 * H])
        o = jax.nn.sigmoid(gates[:, 3 * H:])
        c = f * c + i * g
        h = o * jnp.tanh(c)
        return (h, c), h

    init = (jnp.zeros((B, H), jnp.float32), jnp.zeros((B, H), jnp.float32))
    _, hs = jax.lax.scan(step, init, x_tm)
    return hs


def bilstm_crf_forward_ref(params, input_ids):
    emb = jnp.take(params["embedding"], input_ids, axis=0)
    x_tm = jnp.transpose(emb, (1, 0, 2)).astype(jnp.float32)
    h_f = _lstm_ref(x_tm, params["w_ih_f"], params["w_hh_f"], params["b_ih_f"], params["b_hh_f"])
    h_b = _lstm_ref(x_tm[::-1], params["w_ih_b"], params["w_hh_b"],
                    params["b_ih_b"], params["b_hh_b"])[::-1]
    out = jnp.concatenate([h_f, h_b], axis=-1)
    out = jnp.transpose(out, (1, 0, 2))
    return out @ params["w_out"].T + params["b_out"]


# ---------------------------------------------------------------------------

if __name__ == "__main__":
    # TODO(synk): the CRF submodule is constructed in __init__ but unused by forward(); not implemented.
    vocab_size, num_tags, embedding_dim, hidden_dim = 50, 8, 32, 32
    batch, seq = 2, 8

    key = jax.random.PRNGKey(0)
    k_param, k_data = jax.random.split(key)
    params = init_params(k_param, vocab_size, num_tags, embedding_dim, hidden_dim)
    input_ids = jax.random.randint(k_data, (batch, seq), 0, vocab_size, dtype=jnp.int32)

    emissions = jax.block_until_ready(bilstm_crf_forward(params, input_ids))
    assert emissions.shape == (batch, seq, num_tags), emissions.shape

    ref = jax.block_until_ready(bilstm_crf_forward_ref(params, input_ids))
    np.testing.assert_allclose(np.asarray(emissions), np.asarray(ref), rtol=1e-4, atol=1e-4)

    print("KERNEL_OK")
</pallas_src>

<mosaic_0001>
module attributes {stable_mosaic.version = 11 : i64} {
  func.func @kernel(%arg0: memref<64x64xf32, #tpu.memory_space<vmem>>, %arg1: memref<64x256xf32, #tpu.memory_space<vmem>>, %arg2: memref<1x256xf32, #tpu.memory_space<vmem>>, %arg3: memref<64x256xf32, #tpu.memory_space<vmem>>, %arg4: memref<64x128xf32, #tpu.memory_space<vmem>>, %arg5: memref<1x128xf32, #tpu.memory_space<vmem>>, %arg6: memref<64x128xf32, #tpu.memory_space<vmem>>, %arg7: memref<64x256xf32, #tpu.memory_space<vmem>>, %arg8: memref<64x32xf32, #tpu.memory_space<vmem>>, %arg9: memref<64x32xf32, #tpu.memory_space<vmem>>) attributes {dimension_semantics = [], scalar_prefetch = 0 : i64, scratch_operands = 3 : i64, tpu.core_type = #tpu.core_type<tc>} {
    %c0 = arith.constant 0 : index
    %c0_0 = arith.constant 0 : index
    %0 = vector.load %arg0[%c0, %c0_0] : memref<64x64xf32, #tpu.memory_space<vmem>>, vector<64x64xf32>
    %c0_1 = arith.constant 0 : index
    %c0_2 = arith.constant 0 : index
    %1 = vector.load %arg1[%c0_1, %c0_2] : memref<64x256xf32, #tpu.memory_space<vmem>>, vector<64x256xf32>
    %cst = arith.constant dense<0.000000e+00> : vector<64x256xf32>
    %2 = tpu.matmul %0, %1, %cst {dimension_numbers = #tpu.dot_dimension_numbers<[1], [0], [0], [1], [0, 0, 1, 1], [], []>} : vector<64x64xf32>, vector<64x256xf32>, vector<64x256xf32> -> vector<64x256xf32>
    %c0_3 = arith.constant 0 : index
    %c0_4 = arith.constant 0 : index
    %3 = vector.load %arg2[%c0_3, %c0_4] : memref<1x256xf32, #tpu.memory_space<vmem>>, vector<1x256xf32>
    %4 = vector.broadcast %3 : vector<1x256xf32> to vector<64x256xf32>
    %5 = arith.addf %2, %4 : vector<64x256xf32>
    %c0_5 = arith.constant 0 : index
    %c0_6 = arith.constant 0 : index
    %6 = vector.load %arg7[%c0_5, %c0_6] : memref<64x256xf32, #tpu.memory_space<vmem>>, vector<64x256xf32>
    tpu.vector_store %arg7[%c0_5, %c0_6], %5 {strides = array<i32>} : memref<64x256xf32, #tpu.memory_space<vmem>>, vector<64x256xf32>,
    %cst_7 = arith.constant 0.000000e+00 : f32
    %7 = vector.broadcast %cst_7 : f32 to vector<8x64xf32>
    %cst_8 = arith.constant 0.000000e+00 : f32
    %8 = vector.broadcast %cst_8 : f32 to vector<8x64xf32>
    %c0_i32 = arith.constant 0 : i32
    %c7_i32 = arith.constant 7 : i32
    %9 = arith.subi %c7_i32, %c0_i32 : i32
    %c8_i32 = arith.constant 8 : i32
    %10 = arith.muli %c0_i32, %c8_i32 : i32
    %11 = tpu.assume_multiple %10, 8 : i32
    %c8_i32_9 = arith.constant 8 : i32
    %12 = arith.muli %9, %c8_i32_9 : i32
    %13 = tpu.assume_multiple %12, 8 : i32
    %c0_10 = arith.constant 0 : index
    %c0_11 = arith.constant 0 : index
    %14 = vector.load %arg3[%c0_10, %c0_11] : memref<64x256xf32, #tpu.memory_space<vmem>>, vector<64x256xf32>
    %cst_12 = arith.constant dense<0.000000e+00> : vector<8x256xf32>
    %15 = tpu.matmul %7, %14, %cst_12 {dimension_numbers = #tpu.dot_dimension_numbers<[1], [0], [0], [1], [0, 0, 1, 1], [], []>} : vector<8x64xf32>, vector<64x256xf32>, vector<8x256xf32> -> vector<8x256xf32>
    %16 = arith.index_cast %11 : i32 to index
    %c0_13 = arith.constant 0 : index
    %17 = vector.load %arg7[%16, %c0_13] : memref<64x256xf32, #tpu.memory_space<vmem>>, vector<8x256xf32>
    %18 = arith.addf %17, %15 : vector<8x256xf32>
    %19 = vector.extract_strided_slice %18 {offsets = [0, 0], sizes = [8, 64], strides = [1, 1]} : vector<8x256xf32> to vector<8x64xf32>
    %20 = arith.negf %19 : vector<8x64xf32>
    %21 = math.exp %20 : vector<8x64xf32>
    %cst_14 = arith.constant 1.000000e+00 : f32
    %22 = vector.broadcast %cst_14 : f32 to vector<8x64xf32>
    %23 = arith.addf %22, %21 : vector<8x64xf32>
    %24 = arith.divf %22, %23 : vector<8x64xf32>
    %25 = vector.extract_strided_slice %18 {offsets = [0, 64], sizes = [8, 64], strides = [1, 1]} : vector<8x256xf32> to vector<8x64xf32>
    %26 = arith.negf %25 : vector<8x64xf32>
    %27 = math.exp %26 : vector<8x64xf32>
    %cst_15 = arith.constant 1.000000e+00 : f32
    %28 = vector.broadcast %cst_15 : f32 to vector<8x64xf32>
    %29 = arith.addf %28, %27 : vector<8x64xf32>
    %30 = arith.divf %28, %29 : vector<8x64xf32>
    %31 = vector.extract_strided_slice %18 {offsets = [0, 128], sizes = [8, 64], strides = [1, 1]} : vector<8x256xf32> to vector<8x64xf32>
    %32 = math.tanh %31 : vector<8x64xf32>
    %33 = vector.extract_strided_slice %18 {offsets = [0, 192], sizes = [8, 64], strides = [1, 1]} : vector<8x256xf32> to vector<8x64xf32>
    %34 = arith.negf %33 : vector<8x64xf32>
    %35 = math.exp %34 : vector<8x64xf32>
    %cst_16 = arith.constant 1.000000e+00 : f32
    %36 = vector.broadcast %cst_16 : f32 to vector<8x64xf32>
    %37 = arith.addf %36, %35 : vector<8x64xf32>
    %38 = arith.divf %36, %37 : vector<8x64xf32>
    %39 = arith.mulf %30, %8 : vector<8x64xf32>
    %40 = arith.mulf %24, %32 : vector<8x64xf32>
    %41 = arith.addf %39, %40 : vector<8x64xf32>
    %42 = math.tanh %41 : vector<8x64xf32>
    %43 = arith.mulf %38, %42 : vector<8x64xf32>
    %44 = vector.extract_strided_slice %43 {offsets = [0, 0], sizes = [8, 32], strides = [1, 1]} : vector<8x64xf32> to vector<8x32xf32>
    %45 = arith.index_cast %11 : i32 to index
    %c0_17 = arith.constant 0 : index
    %46 = vector.load %arg8[%45, %c0_17] : memref<64x32xf32, #tpu.memory_space<vmem>>, vector<8x32xf32>
    tpu.vector_store %arg8[%45, %c0_17], %44 {strides = array<i32>} : memref<64x32xf32, #tpu.memory_space<vmem>>, vector<8x32xf32>,
    %47 = vector.extract_strided_slice %43 {offsets = [0, 32], sizes = [8, 32], strides = [1, 1]} : vector<8x64xf32> to vector<8x32xf32>
    %48 = arith.index_cast %13 : i32 to index
    %c0_18 = arith.constant 0 : index
    %49 = vector.load %arg9[%48, %c0_18] : memref<64x32xf32, #tpu.memory_space<vmem>>, vector<8x32xf32>
    tpu.vector_store %arg9[%48, %c0_18], %47 {strides = array<i32>} : memref<64x32xf32, #tpu.memory_space<vmem>>, vector<8x32xf32>,
    %c1_i32 = arith.constant 1 : i32
    %c7_i32_19 = arith.constant 7 : i32
    %50 = arith.subi %c7_i32_19, %c1_i32 : i32
    %c8_i32_20 = arith.constant 8 : i32
    %51 = arith.muli %c1_i32, %c8_i32_20 : i32
    %52 = tpu.assume_multiple %51, 8 : i32
    %c8_i32_21 = arith.constant 8 : i32
    %53 = arith.muli %50, %c8_i32_21 : i32
    %54 = tpu.assume_multiple %53, 8 : i32
    %c0_22 = arith.constant 0 : index
    %c0_23 = arith.constant 0 : index
    %55 = vector.load %arg3[%c0_22, %c0_23] : memref<64x256xf32, #tpu.memory_space<vmem>>, vector<64x256xf32>
    %cst_24 = arith.constant dense<0.000000e+00> : vector<8x256xf32>
    %56 = tpu.matmul %43, %55, %cst_24 {dimension_numbers = #tpu.dot_dimension_numbers<[1], [0], [0], [1], [0, 0, 1, 1], [], []>} : vector<8x64xf32>, vector<64x256xf32>, vector<8x256xf32> -> vector<8x256xf32>
    %57 = arith.index_cast %52 : i32 to index
    %c0_25 = arith.constant 0 : index
    %58 = vector.load %arg7[%57, %c0_25] : memref<64x256xf32, #tpu.memory_space<vmem>>, vector<8x256xf32>
    %59 = arith.addf %58, %56 : vector<8x256xf32>
    %60 = vector.extract_strided_slice %59 {offsets = [0, 0], sizes = [8, 64], strides = [1, 1]} : vector<8x256xf32> to vector<8x64xf32>
    %61 = arith.negf %60 : vector<8x64xf32>
    %62 = math.exp %61 : vector<8x64xf32>
    %cst_26 = arith.constant 1.000000e+00 : f32
    %63 = vector.broadcast %cst_26 : f32 to vector<8x64xf32>
    %64 = arith.addf %63, %62 : vector<8x64xf32>
    %65 = arith.divf %63, %64 : vector<8x64xf32>
    %66 = vector.extract_strided_slice %59 {offsets = [0, 64], sizes = [8, 64], strides = [1, 1]} : vector<8x256xf32> to vector<8x64xf32>
    %67 = arith.negf %66 : vector<8x64xf32>
    %68 = math.exp %67 : vector<8x64xf32>
    %cst_27 = arith.constant 1.000000e+00 : f32
    %69 = vector.broadcast %cst_27 : f32 to vector<8x64xf32>
    %70 = arith.addf %69, %68 : vector<8x64xf32>
    %71 = arith.divf %69, %70 : vector<8x64xf32>
    %72 = vector.extract_strided_slice %59 {offsets = [0, 128], sizes = [8, 64], strides = [1, 1]} : vector<8x256xf32> to vector<8x64xf32>
    %73 = math.tanh %72 : vector<8x64xf32>
    %74 = vector.extract_strided_slice %59 {offsets = [0, 192], sizes = [8, 64], strides = [1, 1]} : vector<8x256xf32> to vector<8x64xf32>
    %75 = arith.negf %74 : vector<8x64xf32>
    %76 = math.exp %75 : vector<8x64xf32>
    %cst_28 = arith.constant 1.000000e+00 : f32
    %77 = vector.broadcast %cst_28 : f32 to vector<8x64xf32>
    %78 = arith.addf %77, %76 : vector<8x64xf32>
    %79 = arith.divf %77, %78 : vector<8x64xf32>
    %80 = arith.mulf %71, %41 : vector<8x64xf32>
    %81 = arith.mulf %65, %73 : vector<8x64xf32>
    %82 = arith.addf %80, %81 : vector<8x64xf32>
    %83 = math.tanh %82 : vector<8x64xf32>
    %84 = arith.mulf %79, %83 : vector<8x64xf32>
    %85 = vector.extract_strided_slice %84 {offsets = [0, 0], sizes = [8, 32], strides = [1, 1]} : vector<8x64xf32> to vector<8x32xf32>
    %86 = arith.index_cast %52 : i32 to index
    %c0_29 = arith.constant 0 : index
    %87 = vector.load %arg8[%86, %c0_29] : memref<64x32xf32, #tpu.memory_space<vmem>>, vector<8x32xf32>
    tpu.vector_store %arg8[%86, %c0_29], %85 {strides = array<i32>} : memref<64x32xf32, #tpu.memory_space<vmem>>, vector<8x32xf32>,
    %88 = vector.extract_strided_slice %84 {offsets = [0, 32], sizes = [8, 32], strides = [1, 1]} : vector<8x64xf32> to vector<8x32xf32>
    %89 = arith.index_cast %54 : i32 to index
    %c0_30 = arith.constant 0 : index
    %90 = vector.load %arg9[%89, %c0_30] : memref<64x32xf32, #tpu.memory_space<vmem>>, vector<8x32xf32>
    tpu.vector_store %arg9[%89, %c0_30], %88 {strides = array<i32>} : memref<64x32xf32, #tpu.memory_space<vmem>>, vector<8x32xf32>,
    %c2_i32 = arith.constant 2 : i32
    %c7_i32_31 = arith.constant 7 : i32
    %91 = arith.subi %c7_i32_31, %c2_i32 : i32
    %c8_i32_32 = arith.constant 8 : i32
    %92 = arith.muli %c2_i32, %c8_i32_32 : i32
    %93 = tpu.assume_multiple %92, 8 : i32
    %c8_i32_33 = arith.constant 8 : i32
    %94 = arith.muli %91, %c8_i32_33 : i32
    %95 = tpu.assume_multiple %94, 8 : i32
    %c0_34 = arith.constant 0 : index
    %c0_35 = arith.constant 0 : index
    %96 = vector.load %arg3[%c0_34, %c0_35] : memref<64x256xf32, #tpu.memory_space<vmem>>, vector<64x256xf32>
    %cst_36 = arith.constant dense<0.000000e+00> : vector<8x256xf32>
    %97 = tpu.matmul %84, %96, %cst_36 {dimension_numbers = #tpu.dot_dimension_numbers<[1], [0], [0], [1], [0, 0, 1, 1], [], []>} : vector<8x64xf32>, vector<64x256xf32>, vector<8x256xf32> -> vector<8x256xf32>
    %98 = arith.index_cast %93 : i32 to index
    %c0_37 = arith.constant 0 : index
    %99 = vector.load %arg7[%98, %c0_37] : memref<64x256xf32, #tpu.memory_space<vmem>>, vector<8x256xf32>
    %100 = arith.addf %99, %97 : vector<8x256xf32>
    %101 = vector.extract_strided_slice %100 {offsets = [0, 0], sizes = [8, 64], strides = [1, 1]} : vector<8x256xf32> to vector<8x64xf32>
    %102 = arith.negf %101 : vector<8x64xf32>
    %103 = math.exp %102 : vector<8x64xf32>
    %cst_38 = arith.constant 1.000000e+00 : f32
    %104 = vector.broadcast %cst_38 : f32 to vector<8x64xf32>
    %105 = arith.addf %104, %103 : vector<8x64xf32>
    %106 = arith.divf %104, %105 : vector<8x64xf32>
    %107 = vector.extract_strided_slice %100 {offsets = [0, 64], sizes = [8, 64], strides = [1, 1]} : vector<8x256xf32> to vector<8x64xf32>
    %108 = arith.negf %107 : vector<8x64xf32>
    %109 = math.exp %108 : vector<8x64xf32>
    %cst_39 = arith.constant 1.000000e+00 : f32
    %110 = vector.broadcast %cst_39 : f32 to vector<8x64xf32>
    %111 = arith.addf %110, %109 : vector<8x64xf32>
    %112 = arith.divf %110, %111 : vector<8x64xf32>
    %113 = vector.extract_strided_slice %100 {offsets = [0, 128], sizes = [8, 64], strides = [1, 1]} : vector<8x256xf32> to vector<8x64xf32>
    %114 = math.tanh %113 : vector<8x64xf32>
    %115 = vector.extract_strided_slice %100 {offsets = [0, 192], sizes = [8, 64], strides = [1, 1]} : vector<8x256xf32> to vector<8x64xf32>
    %116 = arith.negf %115 : vector<8x64xf32>
    %117 = math.exp %116 : vector<8x64xf32>
    %cst_40 = arith.constant 1.000000e+00 : f32
    %118 = vector.broadcast %cst_40 : f32 to vector<8x64xf32>
    %119 = arith.addf %118, %117 : vector<8x64xf32>
    %120 = arith.divf %118, %119 : vector<8x64xf32>
    %121 = arith.mulf %112, %82 : vector<8x64xf32>
    %122 = arith.mulf %106, %114 : vector<8x64xf32>
    %123 = arith.addf %121, %122 : vector<8x64xf32>
    %124 = math.tanh %123 : vector<8x64xf32>
    %125 = arith.mulf %120, %124 : vector<8x64xf32>
    %126 = vector.extract_strided_slice %125 {offsets = [0, 0], sizes = [8, 32], strides = [1, 1]} : vector<8x64xf32> to vector<8x32xf32>
    %127 = arith.index_cast %93 : i32 to index
    %c0_41 = arith.constant 0 : index
    %128 = vector.load %arg8[%127, %c0_41] : memref<64x32xf32, #tpu.memory_space<vmem>>, vector<8x32xf32>
    tpu.vector_store %arg8[%127, %c0_41], %126 {strides = array<i32>} : memref<64x32xf32, #tpu.memory_space<vmem>>, vector<8x32xf32>,
    %129 = vector.extract_strided_slice %125 {offsets = [0, 32], sizes = [8, 32], strides = [1, 1]} : vector<8x64xf32> to vector<8x32xf32>
    %130 = arith.index_cast %95 : i32 to index
    %c0_42 = arith.constant 0 : index
    %131 = vector.load %arg9[%130, %c0_42] : memref<64x32xf32, #tpu.memory_space<vmem>>, vector<8x32xf32>
    tpu.vector_store %arg9[%130, %c0_42], %129 {strides = array<i32>} : memref<64x32xf32, #tpu.memory_space<vmem>>, vector<8x32xf32>,
    %c3_i32 = arith.constant 3 : i32
    %c7_i32_43 = arith.constant 7 : i32
    %132 = arith.subi %c7_i32_43, %c3_i32 : i32
    %c8_i32_44 = arith.constant 8 : i32
    %133 = arith.muli %c3_i32, %c8_i32_44 : i32
    %134 = tpu.assume_multiple %133, 8 : i32
    %c8_i32_45 = arith.constant 8 : i32
    %135 = arith.muli %132, %c8_i32_45 : i32
    %136 = tpu.assume_multiple %135, 8 : i32
    %c0_46 = arith.constant 0 : index
    %c0_47 = arith.constant 0 : index
    %137 = vector.load %arg3[%c0_46, %c0_47] : memref<64x256xf32, #tpu.memory_space<vmem>>, vector<64x256xf32>
    %cst_48 = arith.constant dense<0.000000e+00> : vector<8x256xf32>
    %138 = tpu.matmul %125, %137, %cst_48 {dimension_numbers = #tpu.dot_dimension_numbers<[1], [0], [0], [1], [0, 0, 1, 1], [], []>} : vector<8x64xf32>, vector<64x256xf32>, vector<8x256xf32> -> vector<8x256xf32>
    %139 = arith.index_cast %134 : i32 to index
    %c0_49 = arith.constant 0 : index
    %140 = vector.load %arg7[%139, %c0_49] : memref<64x256xf32, #tpu.memory_space<vmem>>, vector<8x256xf32>
    %141 = arith.addf %140, %138 : vector<8x256xf32>
    %142 = vector.extract_strided_slice %141 {offsets = [0, 0], sizes = [8, 64], strides = [1, 1]} : vector<8x256xf32> to vector<8x64xf32>
    %143 = arith.negf %142 : vector<8x64xf32>
    %144 = math.exp %143 : vector<8x64xf32>
    %cst_50 = arith.constant 1.000000e+00 : f32
    %145 = vector.broadcast %cst_50 : f32 to vector<8x64xf32>
    %146 = arith.addf %145, %144 : vector<8x64xf32>
    %147 = arith.divf %145, %146 : vector<8x64xf32>
    %148 = vector.extract_strided_slice %141 {offsets = [0, 64], sizes = [8, 64], strides = [1, 1]} : vector<8x256xf32> to vector<8x64xf32>
    %149 = arith.negf %148 : vector<8x64xf32>
    %150 = math.exp %149 : vector<8x64xf32>
    %cst_51 = arith.constant 1.000000e+00 : f32
    %151 = vector.broadcast %cst_51 : f32 to vector<8x64xf32>
    %152 = arith.addf %151, %150 : vector<8x64xf32>
    %153 = arith.divf %151, %152 : vector<8x64xf32>
    %154 = vector.extract_strided_slice %141 {offsets = [0, 128], sizes = [8, 64], strides = [1, 1]} : vector<8x256xf32> to vector<8x64xf32>
    %155 = math.tanh %154 : vector<8x64xf32>
    %156 = vector.extract_strided_slice %141 {offsets = [0, 192], sizes = [8, 64], strides = [1, 1]} : vector<8x256xf32> to vector<8x64xf32>
    %157 = arith.negf %156 : vector<8x64xf32>
    %158 = math.exp %157 : vector<8x64xf32>
    %cst_52 = arith.constant 1.000000e+00 : f32
    %159 = vector.broadcast %cst_52 : f32 to vector<8x64xf32>
    %160 = arith.addf %159, %158 : vector<8x64xf32>
    %161 = arith.divf %159, %160 : vector<8x64xf32>
    %162 = arith.mulf %153, %123 : vector<8x64xf32>
    %163 = arith.mulf %147, %155 : vector<8x64xf32>
    %164 = arith.addf %162, %163 : vector<8x64xf32>
    %165 = math.tanh %164 : vector<8x64xf32>
    %166 = arith.mulf %161, %165 : vector<8x64xf32>
    %167 = vector.extract_strided_slice %166 {offsets = [0, 0], sizes = [8, 32], strides = [1, 1]} : vector<8x64xf32> to vector<8x32xf32>
    %168 = arith.index_cast %134 : i32 to index
    %c0_53 = arith.constant 0 : index
    %169 = vector.load %arg8[%168, %c0_53] : memref<64x32xf32, #tpu.memory_space<vmem>>, vector<8x32xf32>
    tpu.vector_store %arg8[%168, %c0_53], %167 {strides = array<i32>} : memref<64x32xf32, #tpu.memory_space<vmem>>, vector<8x32xf32>,
    %170 = vector.extract_strided_slice %166 {offsets = [0, 32], sizes = [8, 32], strides = [1, 1]} : vector<8x64xf32> to vector<8x32xf32>
    %171 = arith.index_cast %136 : i32 to index
    %c0_54 = arith.constant 0 : index
    %172 = vector.load %arg9[%171, %c0_54] : memref<64x32xf32, #tpu.memory_space<vmem>>, vector<8x32xf32>
    tpu.vector_store %arg9[%171, %c0_54], %170 {strides = array<i32>} : memref<64x32xf32, #tpu.memory_space<vmem>>, vector<8x32xf32>,
    %c4_i32 = arith.constant 4 : i32
    %c7_i32_55 = arith.constant 7 : i32
    %173 = arith.subi %c7_i32_55, %c4_i32 : i32
    %c8_i32_56 = arith.constant 8 : i32
    %174 = arith.muli %c4_i32, %c8_i32_56 : i32
    %175 = tpu.assume_multiple %174, 8 : i32
    %c8_i32_57 = arith.constant 8 : i32
    %176 = arith.muli %173, %c8_i32_57 : i32
    %177 = tpu.assume_multiple %176, 8 : i32
    %c0_58 = arith.constant 0 : index
    %c0_59 = arith.constant 0 : index
    %178 = vector.load %arg3[%c0_58, %c0_59] : memref<64x256xf32, #tpu.memory_space<vmem>>, vector<64x256xf32>
    %cst_60 = arith.constant dense<0.000000e+00> : vector<8x256xf32>
    %179 = tpu.matmul %166, %178, %cst_60 {dimension_numbers = #tpu.dot_dimension_numbers<[1], [0], [0], [1], [0, 0, 1, 1], [], []>} : vector<8x64xf32>, vector<64x256xf32>, vector<8x256xf32> -> vector<8x256xf32>
    %180 = arith.index_cast %175 : i32 to index
    %c0_61 = arith.constant 0 : index
    %181 = vector.load %arg7[%180, %c0_61] : memref<64x256xf32, #tpu.memory_space<vmem>>, vector<8x256xf32>
    %182 = arith.addf %181, %179 : vector<8x256xf32>
    %183 = vector.extract_strided_slice %182 {offsets = [0, 0], sizes = [8, 64], strides = [1, 1]} : vector<8x256xf32> to vector<8x64xf32>
    %184 = arith.negf %183 : vector<8x64xf32>
    %185 = math.exp %184 : vector<8x64xf32>
    %cst_62 = arith.constant 1.000000e+00 : f32
    %186 = vector.broadcast %cst_62 : f32 to vector<8x64xf32>
    %187 = arith.addf %186, %185 : vector<8x64xf32>
    %188 = arith.divf %186, %187 : vector<8x64xf32>
    %189 = vector.extract_strided_slice %182 {offsets = [0, 64], sizes = [8, 64], strides = [1, 1]} : vector<8x256xf32> to vector<8x64xf32>
    %190 = arith.negf %189 : vector<8x64xf32>
    %191 = math.exp %190 : vector<8x64xf32>
    %cst_63 = arith.constant 1.000000e+00 : f32
    %192 = vector.broadcast %cst_63 : f32 to vector<8x64xf32>
    %193 = arith.addf %192, %191 : vector<8x64xf32>
    %194 = arith.divf %192, %193 : vector<8x64xf32>
    %195 = vector.extract_strided_slice %182 {offsets = [0, 128], sizes = [8, 64], strides = [1, 1]} : vector<8x256xf32> to vector<8x64xf32>
    %196 = math.tanh %195 : vector<8x64xf32>
    %197 = vector.extract_strided_slice %182 {offsets = [0, 192], sizes = [8, 64], strides = [1, 1]} : vector<8x256xf32> to vector<8x64xf32>
    %198 = arith.negf %197 : vector<8x64xf32>
    %199 = math.exp %198 : vector<8x64xf32>
    %cst_64 = arith.constant 1.000000e+00 : f32
    %200 = vector.broadcast %cst_64 : f32 to vector<8x64xf32>
    %201 = arith.addf %200, %199 : vector<8x64xf32>
    %202 = arith.divf %200, %201 : vector<8x64xf32>
    %203 = arith.mulf %194, %164 : vector<8x64xf32>
    %204 = arith.mulf %188, %196 : vector<8x64xf32>
    %205 = arith.addf %203, %204 : vector<8x64xf32>
    %206 = math.tanh %205 : vector<8x64xf32>
    %207 = arith.mulf %202, %206 : vector<8x64xf32>
    %208 = vector.extract_strided_slice %207 {offsets = [0, 0], sizes = [8, 32], strides = [1, 1]} : vector<8x64xf32> to vector<8x32xf32>
    %209 = arith.index_cast %175 : i32 to index
    %c0_65 = arith.constant 0 : index
    %210 = vector.load %arg8[%209, %c0_65] : memref<64x32xf32, #tpu.memory_space<vmem>>, vector<8x32xf32>
    tpu.vector_store %arg8[%209, %c0_65], %208 {strides = array<i32>} : memref<64x32xf32, #tpu.memory_space<vmem>>, vector<8x32xf32>,
    %211 = vector.extract_strided_slice %207 {offsets = [0, 32], sizes = [8, 32], strides = [1, 1]} : vector<8x64xf32> to vector<8x32xf32>
    %212 = arith.index_cast %177 : i32 to index
    %c0_66 = arith.constant 0 : index
    %213 = vector.load %arg9[%212, %c0_66] : memref<64x32xf32, #tpu.memory_space<vmem>>, vector<8x32xf32>
    tpu.vector_store %arg9[%212, %c0_66], %211 {strides = array<i32>} : memref<64x32xf32, #tpu.memory_space<vmem>>, vector<8x32xf32>,
    %c5_i32 = arith.constant 5 : i32
    %c7_i32_67 = arith.constant 7 : i32
    %214 = arith.subi %c7_i32_67, %c5_i32 : i32
    %c8_i32_68 = arith.constant 8 : i32
    %215 = arith.muli %c5_i32, %c8_i32_68 : i32
    %216 = tpu.assume_multiple %215, 8 : i32
    %c8_i32_69 = arith.constant 8 : i32
    %217 = arith.muli %214, %c8_i32_69 : i32
    %218 = tpu.assume_multiple %217, 8 : i32
    %c0_70 = arith.constant 0 : index
    %c0_71 = arith.constant 0 : index
    %219 = vector.load %arg3[%c0_70, %c0_71] : memref<64x256xf32, #tpu.memory_space<vmem>>, vector<64x256xf32>
    %cst_72 = arith.constant dense<0.000000e+00> : vector<8x256xf32>
    %220 = tpu.matmul %207, %219, %cst_72 {dimension_numbers = #tpu.dot_dimension_numbers<[1], [0], [0], [1], [0, 0, 1, 1], [], []>} : vector<8x64xf32>, vector<64x256xf32>, vector<8x256xf32> -> vector<8x256xf32>
    %221 = arith.index_cast %216 : i32 to index
    %c0_73 = arith.constant 0 : index
    %222 = vector.load %arg7[%221, %c0_73] : memref<64x256xf32, #tpu.memory_space<vmem>>, vector<8x256xf32>
    %223 = arith.addf %222, %220 : vector<8x256xf32>
    %224 = vector.extract_strided_slice %223 {offsets = [0, 0], sizes = [8, 64], strides = [1, 1]} : vector<8x256xf32> to vector<8x64xf32>
    %225 = arith.negf %224 : vector<8x64xf32>
    %226 = math.exp %225 : vector<8x64xf32>
    %cst_74 = arith.constant 1.000000e+00 : f32
    %227 = vector.broadcast %cst_74 : f32 to vector<8x64xf32>
    %228 = arith.addf %227, %226 : vector<8x64xf32>
    %229 = arith.divf %227, %228 : vector<8x64xf32>
    %230 = vector.extract_strided_slice %223 {offsets = [0, 64], sizes = [8, 64], strides = [1, 1]} : vector<8x256xf32> to vector<8x64xf32>
    %231 = arith.negf %230 : vector<8x64xf32>
    %232 = math.exp %231 : vector<8x64xf32>
    %cst_75 = arith.constant 1.000000e+00 : f32
    %233 = vector.broadcast %cst_75 : f32 to vector<8x64xf32>
    %234 = arith.addf %233, %232 : vector<8x64xf32>
    %235 = arith.divf %233, %234 : vector<8x64xf32>
    %236 = vector.extract_strided_slice %223 {offsets = [0, 128], sizes = [8, 64], strides = [1, 1]} : vector<8x256xf32> to vector<8x64xf32>
    %237 = math.tanh %236 : vector<8x64xf32>
    %238 = vector.extract_strided_slice %223 {offsets = [0, 192], sizes = [8, 64], strides = [1, 1]} : vector<8x256xf32> to vector<8x64xf32>
    %239 = arith.negf %238 : vector<8x64xf32>
    %240 = math.exp %239 : vector<8x64xf32>
    %cst_76 = arith.constant 1.000000e+00 : f32
    %241 = vector.broadcast %cst_76 : f32 to vector<8x64xf32>
    %242 = arith.addf %241, %240 : vector<8x64xf32>
    %243 = arith.divf %241, %242 : vector<8x64xf32>
    %244 = arith.mulf %235, %205 : vector<8x64xf32>
    %245 = arith.mulf %229, %237 : vector<8x64xf32>
    %246 = arith.addf %244, %245 : vector<8x64xf32>
    %247 = math.tanh %246 : vector<8x64xf32>
    %248 = arith.mulf %243, %247 : vector<8x64xf32>
    %249 = vector.extract_strided_slice %248 {offsets = [0, 0], sizes = [8, 32], strides = [1, 1]} : vector<8x64xf32> to vector<8x32xf32>
    %250 = arith.index_cast %216 : i32 to index
    %c0_77 = arith.constant 0 : index
    %251 = vector.load %arg8[%250, %c0_77] : memref<64x32xf32, #tpu.memory_space<vmem>>, vector<8x32xf32>
    tpu.vector_store %arg8[%250, %c0_77], %249 {strides = array<i32>} : memref<64x32xf32, #tpu.memory_space<vmem>>, vector<8x32xf32>,
    %252 = vector.extract_strided_slice %248 {offsets = [0, 32], sizes = [8, 32], strides = [1, 1]} : vector<8x64xf32> to vector<8x32xf32>
    %253 = arith.index_cast %218 : i32 to index
    %c0_78 = arith.constant 0 : index
    %254 = vector.load %arg9[%253, %c0_78] : memref<64x32xf32, #tpu.memory_space<vmem>>, vector<8x32xf32>
    tpu.vector_store %arg9[%253, %c0_78], %252 {strides = array<i32>} : memref<64x32xf32, #tpu.memory_space<vmem>>, vector<8x32xf32>,
    %c6_i32 = arith.constant 6 : i32
    %c7_i32_79 = arith.constant 7 : i32
    %255 = arith.subi %c7_i32_79, %c6_i32 : i32
    %c8_i32_80 = arith.constant 8 : i32
    %256 = arith.muli %c6_i32, %c8_i32_80 : i32
    %257 = tpu.assume_multiple %256, 8 : i32
    %c8_i32_81 = arith.constant 8 : i32
    %258 = arith.muli %255, %c8_i32_81 : i32
    %259 = tpu.assume_multiple %258, 8 : i32
    %c0_82 = arith.constant 0 : index
    %c0_83 = arith.constant 0 : index
    %260 = vector.load %arg3[%c0_82, %c0_83] : memref<64x256xf32, #tpu.memory_space<vmem>>, vector<64x256xf32>
    %cst_84 = arith.constant dense<0.000000e+00> : vector<8x256xf32>
    %261 = tpu.matmul %248, %260, %cst_84 {dimension_numbers = #tpu.dot_dimension_numbers<[1], [0], [0], [1], [0, 0, 1, 1], [], []>} : vector<8x64xf32>, vector<64x256xf32>, vector<8x256xf32> -> vector<8x256xf32>
    %262 = arith.index_cast %257 : i32 to index
    %c0_85 = arith.constant 0 : index
    %263 = vector.load %arg7[%262, %c0_85] : memref<64x256xf32, #tpu.memory_space<vmem>>, vector<8x256xf32>
    %264 = arith.addf %263, %261 : vector<8x256xf32>
    %265 = vector.extract_strided_slice %264 {offsets = [0, 0], sizes = [8, 64], strides = [1, 1]} : vector<8x256xf32> to vector<8x64xf32>
    %266 = arith.negf %265 : vector<8x64xf32>
    %267 = math.exp %266 : vector<8x64xf32>
    %cst_86 = arith.constant 1.000000e+00 : f32
    %268 = vector.broadcast %cst_86 : f32 to vector<8x64xf32>
    %269 = arith.addf %268, %267 : vector<8x64xf32>
    %270 = arith.divf %268, %269 : vector<8x64xf32>
    %271 = vector.extract_strided_slice %264 {offsets = [0, 64], sizes = [8, 64], strides = [1, 1]} : vector<8x256xf32> to vector<8x64xf32>
    %272 = arith.negf %271 : vector<8x64xf32>
    %273 = math.exp %272 : vector<8x64xf32>
    %cst_87 = arith.constant 1.000000e+00 : f32
    %274 = vector.broadcast %cst_87 : f32 to vector<8x64xf32>
    %275 = arith.addf %274, %273 : vector<8x64xf32>
    %276 = arith.divf %274, %275 : vector<8x64xf32>
    %277 = vector.extract_strided_slice %264 {offsets = [0, 128], sizes = [8, 64], strides = [1, 1]} : vector<8x256xf32> to vector<8x64xf32>
    %278 = math.tanh %277 : vector<8x64xf32>
    %279 = vector.extract_strided_slice %264 {offsets = [0, 192], sizes = [8, 64], strides = [1, 1]} : vector<8x256xf32> to vector<8x64xf32>
    %280 = arith.negf %279 : vector<8x64xf32>
    %281 = math.exp %280 : vector<8x64xf32>
    %cst_88 = arith.constant 1.000000e+00 : f32
    %282 = vector.broadcast %cst_88 : f32 to vector<8x64xf32>
    %283 = arith.addf %282, %281 : vector<8x64xf32>
    %284 = arith.divf %282, %283 : vector<8x64xf32>
    %285 = arith.mulf %276, %246 : vector<8x64xf32>
    %286 = arith.mulf %270, %278 : vector<8x64xf32>
    %287 = arith.addf %285, %286 : vector<8x64xf32>
    %288 = math.tanh %287 : vector<8x64xf32>
    %289 = arith.mulf %284, %288 : vector<8x64xf32>
    %290 = vector.extract_strided_slice %289 {offsets = [0, 0], sizes = [8, 32], strides = [1, 1]} : vector<8x64xf32> to vector<8x32xf32>
    %291 = arith.index_cast %257 : i32 to index
    %c0_89 = arith.constant 0 : index
    %292 = vector.load %arg8[%291, %c0_89] : memref<64x32xf32, #tpu.memory_space<vmem>>, vector<8x32xf32>
    tpu.vector_store %arg8[%291, %c0_89], %290 {strides = array<i32>} : memref<64x32xf32, #tpu.memory_space<vmem>>, vector<8x32xf32>,
    %293 = vector.extract_strided_slice %289 {offsets = [0, 32], sizes = [8, 32], strides = [1, 1]} : vector<8x64xf32> to vector<8x32xf32>
    %294 = arith.index_cast %259 : i32 to index
    %c0_90 = arith.constant 0 : index
    %295 = vector.load %arg9[%294, %c0_90] : memref<64x32xf32, #tpu.memory_space<vmem>>, vector<8x32xf32>
    tpu.vector_store %arg9[%294, %c0_90], %293 {strides = array<i32>} : memref<64x32xf32, #tpu.memory_space<vmem>>, vector<8x32xf32>,
    %c7_i32_91 = arith.constant 7 : i32
    %c7_i32_92 = arith.constant 7 : i32
    %296 = arith.subi %c7_i32_92, %c7_i32_91 : i32
    %c8_i32_93 = arith.constant 8 : i32
    %297 = arith.muli %c7_i32_91, %c8_i32_93 : i32
    %298 = tpu.assume_multiple %297, 8 : i32
    %c8_i32_94 = arith.constant 8 : i32
    %299 = arith.muli %296, %c8_i32_94 : i32
    %300 = tpu.assume_multiple %299, 8 : i32
    %c0_95 = arith.constant 0 : index
    %c0_96 = arith.constant 0 : index
    %301 = vector.load %arg3[%c0_95, %c0_96] : memref<64x256xf32, #tpu.memory_space<vmem>>, vector<64x256xf32>
    %cst_97 = arith.constant dense<0.000000e+00> : vector<8x256xf32>
    %302 = tpu.matmul %289, %301, %cst_97 {dimension_numbers = #tpu.dot_dimension_numbers<[1], [0], [0], [1], [0, 0, 1, 1], [], []>} : vector<8x64xf32>, vector<64x256xf32>, vector<8x256xf32> -> vector<8x256xf32>
    %303 = arith.index_cast %298 : i32 to index
    %c0_98 = arith.constant 0 : index
    %304 = vector.load %arg7[%303, %c0_98] : memref<64x256xf32, #tpu.memory_space<vmem>>, vector<8x256xf32>
    %305 = arith.addf %304, %302 : vector<8x256xf32>
    %306 = vector.extract_strided_slice %305 {offsets = [0, 0], sizes = [8, 64], strides = [1, 1]} : vector<8x256xf32> to vector<8x64xf32>
    %307 = arith.negf %306 : vector<8x64xf32>
    %308 = math.exp %307 : vector<8x64xf32>
    %cst_99 = arith.constant 1.000000e+00 : f32
    %309 = vector.broadcast %cst_99 : f32 to vector<8x64xf32>
    %310 = arith.addf %309, %308 : vector<8x64xf32>
    %311 = arith.divf %309, %310 : vector<8x64xf32>
    %312 = vector.extract_strided_slice %305 {offsets = [0, 64], sizes = [8, 64], strides = [1, 1]} : vector<8x256xf32> to vector<8x64xf32>
    %313 = arith.negf %312 : vector<8x64xf32>
    %314 = math.exp %313 : vector<8x64xf32>
    %cst_100 = arith.constant 1.000000e+00 : f32
    %315 = vector.broadcast %cst_100 : f32 to vector<8x64xf32>
    %316 = arith.addf %315, %314 : vector<8x64xf32>
    %317 = arith.divf %315, %316 : vector<8x64xf32>
    %318 = vector.extract_strided_slice %305 {offsets = [0, 128], sizes = [8, 64], strides = [1, 1]} : vector<8x256xf32> to vector<8x64xf32>
    %319 = math.tanh %318 : vector<8x64xf32>
    %320 = vector.extract_strided_slice %305 {offsets = [0, 192], sizes = [8, 64], strides = [1, 1]} : vector<8x256xf32> to vector<8x64xf32>
    %321 = arith.negf %320 : vector<8x64xf32>
    %322 = math.exp %321 : vector<8x64xf32>
    %cst_101 = arith.constant 1.000000e+00 : f32
    %323 = vector.broadcast %cst_101 : f32 to vector<8x64xf32>
    %324 = arith.addf %323, %322 : vector<8x64xf32>
    %325 = arith.divf %323, %324 : vector<8x64xf32>
    %326 = arith.mulf %317, %287 : vector<8x64xf32>
    %327 = arith.mulf %311, %319 : vector<8x64xf32>
    %328 = arith.addf %326, %327 : vector<8x64xf32>
    %329 = math.tanh %328 : vector<8x64xf32>
    %330 = arith.mulf %325, %329 : vector<8x64xf32>
    %331 = vector.extract_strided_slice %330 {offsets = [0, 0], sizes = [8, 32], strides = [1, 1]} : vector<8x64xf32> to vector<8x32xf32>
    %332 = arith.index_cast %298 : i32 to index
    %c0_102 = arith.constant 0 : index
    %333 = vector.load %arg8[%332, %c0_102] : memref<64x32xf32, #tpu.memory_space<vmem>>, vector<8x32xf32>
    tpu.vector_store %arg8[%332, %c0_102], %331 {strides = array<i32>} : memref<64x32xf32, #tpu.memory_space<vmem>>, vector<8x32xf32>,
    %334 = vector.extract_strided_slice %330 {offsets = [0, 32], sizes = [8, 32], strides = [1, 1]} : vector<8x64xf32> to vector<8x32xf32>
    %335 = arith.index_cast %300 : i32 to index
    %c0_103 = arith.constant 0 : index
    %336 = vector.load %arg9[%335, %c0_103] : memref<64x32xf32, #tpu.memory_space<vmem>>, vector<8x32xf32>
    tpu.vector_store %arg9[%335, %c0_103], %334 {strides = array<i32>} : memref<64x32xf32, #tpu.memory_space<vmem>>, vector<8x32xf32>,
    %c8_i32_104 = arith.constant 8 : i32
    %c0_105 = arith.constant 0 : index
    %c0_106 = arith.constant 0 : index
    %337 = vector.load %arg8[%c0_105, %c0_106] : memref<64x32xf32, #tpu.memory_space<vmem>>, vector<64x32xf32>
    %c0_107 = arith.constant 0 : index
    %c0_108 = arith.constant 0 : index
    %338 = vector.load %arg9[%c0_107, %c0_108] : memref<64x32xf32, #tpu.memory_space<vmem>>, vector<64x32xf32>
    %339 = tpu.concatenate %337, %338 in 1 : vector<64x32xf32>, vector<64x32xf32> -> vector<64x64xf32>
    %c0_109 = arith.constant 0 : index
    %c0_110 = arith.constant 0 : index
    %340 = vector.load %arg4[%c0_109, %c0_110] : memref<64x128xf32, #tpu.memory_space<vmem>>, vector<64x128xf32>
    %cst_111 = arith.constant dense<0.000000e+00> : vector<64x128xf32>
    %341 = tpu.matmul %339, %340, %cst_111 {dimension_numbers = #tpu.dot_dimension_numbers<[1], [0], [0], [1], [0, 0, 1, 1], [], []>} : vector<64x64xf32>, vector<64x128xf32>, vector<64x128xf32> -> vector<64x128xf32>
    %c0_112 = arith.constant 0 : index
    %c0_113 = arith.constant 0 : index
    %342 = vector.load %arg5[%c0_112, %c0_113] : memref<1x128xf32, #tpu.memory_space<vmem>>, vector<1x128xf32>
    %343 = vector.broadcast %342 : vector<1x128xf32> to vector<64x128xf32>
    %344 = arith.addf %341, %343 : vector<64x128xf32>
    %c0_114 = arith.constant 0 : index
    %c0_115 = arith.constant 0 : index
    %345 = vector.load %arg6[%c0_114, %c0_115] : memref<64x128xf32, #tpu.memory_space<vmem>>, vector<64x128xf32>
    tpu.vector_store %arg6[%c0_114, %c0_115], %344 {strides = array<i32>} : memref<64x128xf32, #tpu.memory_space<vmem>>, vector<64x128xf32>,
    return
  }
}

</mosaic_0001>

<bundles_post_ra>
// kernel: tpu_custom_call.1
= control target key start
LH: loop header
LB: loop body
LE: loop exit
PB: predicated region body
PF: predicated region fallthrough
CT: control target
= control target key end

     0   :  { %11 = vsyncpa [#allocation6], 0  ;;  %s2157_s0 = inlined_call_operand.hbm [shape: f32[64,64], index: 0, kind: input, shape index: {}]   ;;  %s2158_s1 = inlined_call_operand.hbm [shape: f32[64,256], index: 1, kind: input, shape index: {}]   ;;  %s2159_s2 = inlined_call_operand.hbm [shape: f32[1,256], index: 2, kind: input, shape index: {}]   ;;  %s2160_s3 = inlined_call_operand.hbm [shape: f32[64,256], index: 3, kind: input, shape index: {}]   ;;  %s2161_s4 = inlined_call_operand.hbm [shape: f32[64,128], index: 4, kind: input, shape index: {}]   ;;  %s2162_s5 = inlined_call_operand.vmem [shape: f32[1,128], index: 5, kind: input, shape index: {}]   ;;  %s2163_s6 = inlined_call_operand.hbm [shape: f32[64,128], index: 6, kind: output, shape index: {}]  }
   0x1   :  { %12 = vsyncpa [#allocation9], 0 }
   0x2   :  { %13 = vsyncpa [#allocation12], 0  ;;  %s32_s23 = sshll.u32 %s2158_s1, 4  ;;  %s33_s23 = int_to_ptr.hbm [resolvable:$true] %s32_s23 }
   0x3   :  { %14 = vsyncpa [#allocation7], 0  ;;  %s1746_s24 = smov [#allocation8]   ;;  %s56_s28 = sshll.u32 %s2160_s3, 4  ;;  %s57_s28 = int_to_ptr.hbm [resolvable:$true] %s56_s28 }
   0x4   :  { %s34_s25 = sshll.u32 %s1746_s24, 4  ;;  %s1747_s29 = smov 256   ;;  %s35_s25 = int_to_ptr.vmem [resolvable:$true] %s34_s25 }
   0x5   :  { %s1748_s30 = smov 16   ;;  %s1749_s7 = smov [#allocation11]  }
   0x6   :  { %40 = dma.hbm_to_vmem [thread:$0]  %s33_s23, 2048, %s35_s25, [#allocation9], %s1747_s29, %s1747_s29, %s1748_s30  }
   0x7   :  { %s58_s8 = sshll.u32 %s1749_s7, 4  ;;  %s19_s11 = sshll.u32 %s2157_s0, 4  ;;  %s59_s8 = int_to_ptr.vmem [resolvable:$true] %s58_s8  ;;  %s20_s11 = int_to_ptr.hbm [resolvable:$true] %s19_s11 }
   0x8   :  { %64 = dma.hbm_to_vmem [thread:$0]  %s57_s28, 2048, %s59_s8, [#allocation12], %s1747_s29, %s1747_s29, %s1748_s30  }
   0x9   :  { %s1750_s1 = smov [#allocation5]   ;;  %s46_s3 = sshll.u32 %s2159_s2, 4  ;;  %s47_s3 = int_to_ptr.hbm [resolvable:$true] %s46_s3 }
   0xa   :  { %s21_s12 = sshll.u32 %s1750_s1, 4  ;;  %s1751_s15 = smov 128   ;;  %s22_s12 = int_to_ptr.vmem [resolvable:$true] %s21_s12 }
   0xb   :  { %s1752_s16 = smov 8   ;;  %s1753_s17 = smov [#allocation10]  }
   0xc   :  { %27 = dma.hbm_to_vmem [thread:$0]  %s20_s11, 1024, %s22_s12, [#allocation6], %s1751_s15, %s1751_s15, %s1752_s16  }
   0xd   :  { %s48_s18 = sshll.u32 %s1753_s17, 4  ;;  %s69_s20 = sshll.u32 %s2161_s4, 4  ;;  %s49_s18 = int_to_ptr.vmem [resolvable:$true] %s48_s18  ;;  %s70_s20 = int_to_ptr.hbm [resolvable:$true] %s69_s20 }
   0xe   :  { %51 = dma.hbm_to_vmem [thread:$0]  %s47_s3, 32, %s49_s18, [#allocation9]  }
   0xf   :  { %s1754_s21 = smov [#allocation13]  }
  0x10   :  { %s71_s22 = sshll.u32 %s1754_s21, 4  ;;  %s72_s22 = int_to_ptr.vmem [resolvable:$true] %s71_s22 }
  0x11   :  { %77 = dma.hbm_to_vmem [thread:$0]  %s70_s20, 1024, %s72_s22, [#allocation12], %s1751_s15, %s1751_s15, %s1752_s16  }
  0x12   :  { %1738 = dma.done.wait [#allocation6], 1024  }
  0x13   :  { %1739 = vsyncadd [#allocation6], 4294966272 }
  0x14   :  { %1740 = dma.done.wait [#allocation9], 2080  }
  0x15   :  { %1741 = vsyncadd [#allocation9], 4294965216 }
  0x16   :  { %1742 = dma.done.wait [#allocation12], 3072  }
  0x17   :  { %1743 = vsyncadd [#allocation12], 4294964224  ;;  %v122_v0 = vld [vmem:[#allocation8 + $0x70] sm:$0xff]  ;;  %v120_v1 = vld [vmem:[#allocation8 + $0x60] sm:$0xff]  ;;  %vm130_vm0 = vcmask 523264   ;;  %v1755_v40 = vmov 0.0  }
  0x18   :  { %1468 = vmatpush.msra.mxu2 %v122_v0  ;;  %163 = vmatpush.msra.mxu1 %v122_v0  ;;  %v118_v2 = vld [vmem:[#allocation8 + $0x50] sm:$0xff]  ;;  %v116_v4 = vld [vmem:[#allocation8 + $0x40] sm:$0xff]  ;;  %v1829_v13 = vld [vmem:[#allocation5 + $0x18] sm:$0xff]  ;;  %s1756_s2 = smov 64   ;;  %vm371_vm9 = vcmask 261120   ;;  %s1757_s4 = smov 32  }
  0x19   :  { %1469 = vmatpush.msra.mxu3 %v122_v0  ;;  %v1815_v3 = vld [vmem:[#allocation11 + $0x70] sm:$0xff]  ;;  %v1818_v5 = vld [vmem:[#allocation11 + $0x60] sm:$0xff]  ;;  %v1843_v18 = vld [vmem:[#allocation11 + $0x78] sm:$0xff]  ;;  %s1392_s28 = sshll.u32 %s2163_s6, 4  ;;  %s1393_s28 = int_to_ptr.hbm [resolvable:$true] %s1392_s28 }
  0x1a   :  { %1470 = vmatpush.msra.mxu2 %v120_v1  ;;  %164 = vmatpush.msra.mxu1 %v120_v1  ;;  %v114_v6 = vld [vmem:[#allocation8 + $0x30] sm:$0xff]  ;;  %v112_v8 = vld [vmem:[#allocation8 + $0x20] sm:$0xff]  ;;  %v123_v17 = vld [vmem:[#allocation8 + $0x78] sm:$0xff] }
  0x1b   :  { %1471 = vmatpush.msra.mxu3 %v120_v1  ;;  %776 = vmatpush.msra.mxu0 %v1815_v3  ;;  %v1821_v7 = vld [vmem:[#allocation11 + $0x50] sm:$0xff]  ;;  %v1824_v9 = vld [vmem:[#allocation11 + $0x40] sm:$0xff]  ;;  %v1848_v20 = vld [vmem:[#allocation11 + $0x68] sm:$0xff] }
  0x1c   :  { %1472 = vmatpush.msra.mxu2 %v118_v2  ;;  %165 = vmatpush.msra.mxu1 %v118_v2  ;;  %v110_v10 = vld [vmem:[#allocation8 + $0x10] sm:$0xff]  ;;  %v108_v12 = vld [vmem:[#allocation8] sm:$0xff]  ;;  %v121_v19 = vld [vmem:[#allocation8 + $0x68] sm:$0xff] }
  0x1d   :  { %1473 = vmatpush.msra.mxu3 %v118_v2  ;;  %777 = vmatpush.msra.mxu0 %v1818_v5  ;;  %v1827_v11 = vld [vmem:[#allocation11 + $0x30] sm:$0xff]  ;;  %v1832_v14 = vld [vmem:[#allocation5] sm:$0xff]  ;;  %v101_v25 = vld [vmem:[#allocation5 + $0x8] sm:$0xff] }
  0x1e   :  { %1474 = vmatpush.msra.mxu2 %v116_v4  ;;  %166 = vmatpush.msra.mxu1 %v116_v4  ;;  %v1834_v15 = vld [vmem:[#allocation11 + $0x20] sm:$0xff]  ;;  %v1837_v16 = vld [vmem:[#allocation5 + $0x30] sm:$0xff]  ;;  %v119_v22 = vld [vmem:[#allocation8 + $0x58] sm:$0xff] }
  0x1f   :  { %1475 = vmatpush.msra.mxu3 %v116_v4  ;;  %778 = vmatpush.msra.mxu0 %v1821_v7  ;;  %v1852_v21 = vld [vmem:[#allocation11 + $0x10] sm:$0xff]  ;;  %v1854_v23 = vld [vmem:[#allocation11 + $0x58] sm:$0xff]  ;;  %v1861_v26 = vld [vmem:[#allocation11] sm:$0xff] }
  0x20   :  { %1476 = vmatpush.msra.mxu2 %v114_v6  ;;  %167 = vmatpush.msra.mxu1 %v114_v6  ;;  %v1858_v24 = vld [vmem:[#allocation5 + $0x20] sm:$0xff]  ;;  %v1863_v27 = vld [vmem:[#allocation11 + $0x48] sm:$0xff]  ;;  %v1868_v28 = vld [vmem:[#allocation5 + $0x38] sm:$0xff] }
  0x21   :  { %1477 = vmatpush.msra.mxu3 %v114_v6  ;;  %779 = vmatpush.msra.mxu0 %v1824_v9  ;;  %v117_v29 = vld [vmem:[#allocation8 + $0x48] sm:$0xff]  ;;  %v1873_v30 = vld [vmem:[#allocation11 + $0x38] sm:$0xff]  ;;  %v102_v36 = vld [vmem:[#allocation5 + $0x10] sm:$0xff] }
  0x22   :  { %1478 = vmatpush.msra.mxu2 %v112_v8  ;;  %168 = vmatpush.msra.mxu1 %v112_v8  ;;  %v115_v31 = vld [vmem:[#allocation8 + $0x38] sm:$0xff]  ;;  %v1879_v32 = vld [vmem:[#allocation11 + $0x28] sm:$0xff]  ;;  %v124_v41 = vld [vmem:[#allocation10] sm:$0x3] }
  0x23   :  { %1479 = vmatpush.msra.mxu3 %v112_v8  ;;  %780 = vmatpush.msra.mxu0 %v1827_v11  ;;  %v113_v33 = vld [vmem:[#allocation8 + $0x28] sm:$0xff]  ;;  %v1883_v34 = vld [vmem:[#allocation11 + $0x18] sm:$0xff]  ;;  %v126_v43 = vperm.slane %v124_v41, 0  ;;  %v1965_v0 = vperm.slane %v124_v41, 1 }
  0x24   :  { %1480 = vmatpush.msra.mxu2 %v110_v10  ;;  %169 = vmatpush.msra.mxu1 %v110_v10  ;;  %v1885_v35 = vld [vmem:[#allocation5 + $0x28] sm:$0xff]  ;;  %v111_v38 = vld [vmem:[#allocation8 + $0x18] sm:$0xff] }
  0x25   :  { %1481 = vmatpush.msra.mxu3 %v110_v10  ;;  %781 = vmatpush.msra.mxu0 %v1834_v15  ;;  %v1889_v37 = vld [vmem:[#allocation11 + $0x8] sm:$0xff] }
  0x26   :  { %1482 = vmatpush.msra.mxu2 %v108_v12  ;;  %170 = vmatpush.msra.mxu1 %v108_v12  ;;  %v109_v39 = vld [vmem:[#allocation8 + $0x8] sm:$0xff] }
  0x27   :  { %1417 = vmatmul.msk.f32.vlgmr.msra.gmra.mxu2 %vm130_vm0, %v1829_v13  ;;  %1414 = vmatmul.msk.f32.vlgmr.msra.gmra.mxu1 %vm130_vm0, %v1832_v14 }
  0x28   :  { %280 = vmatpush.msrb.mxu2 %v1815_v3  ;;  %1483 = vmatpush.msra.mxu3 %v108_v12 }
  0x29   :  { %1420 = vmatmul.msk.f32.vlgmr.msra.gmra.mxu3 %vm130_vm0, %v1837_v16  ;;  %204 = vmatpush.msrb.mxu1 %v123_v17 }
  0x2a   :  { %281 = vmatpush.msrb.mxu2 %v1818_v5  ;;  %300 = vmatpush.msrb.mxu3 %v1843_v18 }
  0x2b   :  { %205 = vmatpush.msrb.mxu1 %v121_v19  ;;  %782 = vmatpush.msra.mxu0 %v1852_v21 }
  0x2c   :  { %282 = vmatpush.msrb.mxu2 %v1821_v7  ;;  %301 = vmatpush.msrb.mxu3 %v1848_v20 }
  0x2d   :  { %206 = vmatpush.msrb.mxu1 %v119_v22  ;;  %783 = vmatpush.msra.mxu0 %v1861_v26 }
  0x2e   :  { %283 = vmatpush.msrb.mxu2 %v1824_v9  ;;  %302 = vmatpush.msrb.mxu3 %v1854_v23 }
  0x2f   :  { %1418 = vmatmul.msk.f32.gmra.mxu2 %vm130_vm0, %v1858_v24  ;;  %1415 = vmatmul.msk.f32.gmra.mxu1 %vm130_vm0, %v101_v25 }
  0x30   :  { %284 = vmatpush.msrb.mxu2 %v1827_v11  ;;  %303 = vmatpush.msrb.mxu3 %v1863_v27 }
  0x31   :  { %1421 = vmatmul.msk.f32.gmra.mxu3 %vm130_vm0, %v1868_v28  ;;  %207 = vmatpush.msrb.mxu1 %v117_v29 }
  0x32   :  { %285 = vmatpush.msrb.mxu2 %v1834_v15  ;;  %304 = vmatpush.msrb.mxu3 %v1873_v30 }
  0x33   :  { %208 = vmatpush.msrb.mxu1 %v115_v31 }
  0x34   :  { %286 = vmatpush.msrb.mxu2 %v1852_v21  ;;  %305 = vmatpush.msrb.mxu3 %v1879_v32 }
  0x35   :  { %209 = vmatpush.msrb.mxu1 %v113_v33 }
  0x36   :  { %287 = vmatpush.msrb.mxu2 %v1861_v26  ;;  %306 = vmatpush.msrb.mxu3 %v1883_v34 }
  0x37   :  { %1419 = vmatmul.msk.f32.gmra.mxu2 %vm130_vm0, %v1885_v35  ;;  %1416 = vmatmul.msk.f32.gmra.mxu1 %vm130_vm0, %v102_v36 }
  0x38   :  { %307 = vmatpush.msrb.mxu3 %v1889_v37  ;;  %210 = vmatpush.msrb.mxu1 %v111_v38 }
  0x39   :  { %308 = vmatmul.f32.vlgmr.msrb.gmra.mxu3 %v1755_v40  ;;  %404 = vmatpush.msra.mxu2 %v1815_v3 }
  0x3a   :  { %211 = vmatpush.msrb.mxu1 %v109_v39  ;;  %424 = vmatpush.msra.mxu3 %v1843_v18 }
  0x3b   :  { %405 = vmatpush.msra.mxu2 %v1818_v5 }
  0x3c   :  { %796 = vmatpush.msra.mxu1 %v1843_v18  ;;  %425 = vmatpush.msra.mxu3 %v1848_v20 }
  0x3d   :  { %406 = vmatpush.msra.mxu2 %v1821_v7 }
  0x3e   :  { %797 = vmatpush.msra.mxu1 %v1848_v20  ;;  %426 = vmatpush.msra.mxu3 %v1854_v23 }
  0x3f   :  { %288 = vmatmul.f32.vlgmr.msrb.gmra.mxu2 %v1755_v40  ;;  %1422 = vmatmul.msk.f32.vlgmr.msrb.gmra.mxu1 %vm130_vm0, %v1832_v14 }
  0x40   :  { %407 = vmatpush.msra.mxu2 %v1824_v9  ;;  %427 = vmatpush.msra.mxu3 %v1863_v27 }
  0x41   :  { %798 = vmatpush.msra.mxu1 %v1854_v23 }
  0x42   :  { %408 = vmatpush.msra.mxu2 %v1827_v11  ;;  %428 = vmatpush.msra.mxu3 %v1873_v30 }
  0x43   :  { %799 = vmatpush.msra.mxu1 %v1863_v27 }
  0x44   :  { %409 = vmatpush.msra.mxu2 %v1834_v15  ;;  %429 = vmatpush.msra.mxu3 %v1879_v32 }
  0x45   :  { %800 = vmatpush.msra.mxu1 %v1873_v30 }
  0x46   :  { %410 = vmatpush.msra.mxu2 %v1852_v21  ;;  %430 = vmatpush.msra.mxu3 %v1883_v34 }
  0x47   :  { %1423 = vmatmul.msk.f32.gmra.mxu1 %vm130_vm0, %v101_v25 }
  0x48   :  { %411 = vmatpush.msra.mxu2 %v1861_v26  ;;  %431 = vmatpush.msra.mxu3 %v1889_v37 }
  0x49   :  { %801 = vmatpush.msra.mxu1 %v1879_v32 }
  0x4a   :  { %528 = vmatpush.msrb.mxu2 %v1815_v3  ;;  %548 = vmatpush.msrb.mxu3 %v1843_v18 }
  0x4b   :  { %802 = vmatpush.msra.mxu1 %v1883_v34 }
  0x4c   :  { %529 = vmatpush.msrb.mxu2 %v1818_v5  ;;  %549 = vmatpush.msrb.mxu3 %v1848_v20 }
  0x4d   :  { %803 = vmatpush.msra.mxu1 %v1889_v37 }
  0x4e   :  { %530 = vmatpush.msrb.mxu2 %v1821_v7  ;;  %550 = vmatpush.msrb.mxu3 %v1854_v23 }
  0x4f   :  { %1424 = vmatmul.msk.f32.gmra.mxu1 %vm130_vm0, %v102_v36 }
  0x50   :  { %531 = vmatpush.msrb.mxu2 %v1824_v9  ;;  %551 = vmatpush.msrb.mxu3 %v1863_v27 }
  0x52   :  { %532 = vmatpush.msrb.mxu2 %v1827_v11  ;;  %552 = vmatpush.msrb.mxu3 %v1873_v30 }
  0x54   :  { %533 = vmatpush.msrb.mxu2 %v1834_v15  ;;  %553 = vmatpush.msrb.mxu3 %v1879_v32 }
  0x56   :  { %534 = vmatpush.msrb.mxu2 %v1852_v21  ;;  %554 = vmatpush.msrb.mxu3 %v1883_v34 }
  0x57   :  { %1425 = vmatmul.msk.f32.gmra.mxu1 %vm130_vm0, %v1829_v13 }
  0x58   :  { %535 = vmatpush.msrb.mxu2 %v1861_v26  ;;  %555 = vmatpush.msrb.mxu3 %v1889_v37 }
  0x5f   :  { %1426 = vmatmul.msk.f32.gmra.mxu1 %vm130_vm0, %v1858_v24 }
  0x67   :  { %1427 = vmatmul.msk.f32.gmra.mxu1 %vm130_vm0, %v1885_v35 }
  0x6f   :  { %1428 = vmatmul.msk.f32.gmra.mxu1 %vm130_vm0, %v1837_v16 }
  0x77   :  { %1429 = vmatmul.msk.f32.gmra.mxu1 %vm130_vm0, %v1868_v28 }
  0xa4   :  { %v172_v42 = vpop.f32.mrf.mxu1 }
  0xa5   :  { %v173_v58 = vadd.f32 %v172_v42, %v126_v43 }
  0xaa   :  { %v181_v44 = vpop.f32.mrf.mxu2 }
  0xab   :  { %v1951_v45 = vadd.f32 %v181_v44, %v126_v43 }
  0xac   :  { %v175_v46 = vpop.f32.mrf.mxu1  ;;  %v190_v47 = vpop.f32.mrf.mxu3 }
  0xad   :  { %v1953_v48 = vadd.f32 %v175_v46, %v126_v43  ;;  %v1955_v49 = vadd.f32 %v190_v47, %v126_v43 }
  0xb2   :  { %v184_v50 = vpop.f32.mrf.mxu2 }
  0xb3   :  { %v1957_v51 = vadd.f32 %v184_v50, %v126_v43 }
  0xb4   :  { %v178_v52 = vpop.f32.mrf.mxu1  ;;  %v193_v53 = vpop.f32.mrf.mxu3 }
  0xb5   :  { %v1959_v54 = vadd.f32 %v178_v52, %v126_v43  ;;  %v1961_v55 = vadd.f32 %v193_v53, %v126_v43 }
  0xba   :  { %v187_v56 = vpop.f32.mrf.mxu2 }
  0xbb   :  { %v1963_v57 = vadd.f32 %v187_v56, %v126_v43 }
  0xbc   :  { %v213_v1 = vpop.f32.mrf.mxu1  ;;  %v309_v4 = vpop.f32.mrf.mxu3 }
  0xbd   :  { %v214_v2 = vadd.f32 %v213_v1, %v1965_v0 }
  0xbf   :  { %v318_v8 = vadd.f32 %v309_v4, %v214_v2 }
  0xc1   :  { %v1431_v29 = vmul.f32 -1.442695, %v318_v8 }
  0xc2   :  { %v289_v59 = vpop.f32.mrf.mxu2 }
  0xc3   :  { %v317_v60 = vadd.f32 %v289_v59, %v173_v58 }
  0xc4   :  { %v216_v1 = vpop.f32.mrf.mxu1 }
  0xc5   :  { %v1430_v61 = vmul.f32 -1.442695, %v317_v60  ;;  %v217_v2 = vadd.f32 %v216_v1, %v1965_v0 }
  0xc7   :  { %1498 = vpow2.f32 %v1430_v61 }
  0xcd   :  { %v1499_v62 = vpop.eup %1498 }
  0xce   :  { %v322_v63 = vadd.f32 1.0, %v1499_v62 }
  0xd0   :  { %1500 = vrcp.f32 %v322_v63  ;;  %v334_v13 = vand.u32 2147483648, %v322_v63  ;;  %v332_v16 = vand.u32 2147483647, %v322_v63  ;;  %vm328_vm2 = vweird.f32 %v322_v63 }
  0xd1   :  { %1502 = vtanh.f32 %v318_v8 }
  0xd2   :  { %v335_v22 = vor.u32 1.1754944e-38, %v334_v13  ;;  %vm333_vm4 = vcmp.eq.f32.partialorder %v332_v16, 8.507059e+37  ;;  %1504 = vpow2.f32 %v1431_v29 }
  0xd6   :  { %v1501_v6 = vpop.eup %1500 }
  0xd7   :  { %v324_v10 = vmul.f32 %v1501_v6, %v322_v63  ;;  %vm329_vm1 = vweird.f32 %v1501_v6  ;;  %v1503_v19 = vpop.eup %1502 }
  0xd8   :  { %vm330_vm3 = vmor %vm328_vm2, %vm329_vm1  ;;  %v1505_v31 = vpop.eup %1504 }
  0xd9   :  { %v325_v12 = vsub.f32 1.0, %v324_v10  ;;  %v342_v33 = vadd.f32 1.0, %v1505_v31 }
  0xdb   :  { %v326_v14 = vmul.f32 %v1501_v6, %v325_v12  ;;  %1506 = vrcp.f32 %v342_v33  ;;  %vm348_vm5 = vweird.f32 %v342_v33  ;;  %v354_v43 = vand.u32 2147483648, %v342_v33 }
  0xdc   :  { %v352_v46 = vand.u32 2147483647, %v342_v33 }
  0xdd   :  { %v327_v17 = vadd.f32 %v1501_v6, %v326_v14  ;;  %v355_v47 = vor.u32 1.1754944e-38, %v354_v43 }
  0xde   :  { %vm353_vm8 = vcmp.eq.f32.partialorder %v352_v46, 8.507059e+37 }
  0xdf   :  { %v331_v24 = vsel %vm330_vm3, %v1501_v6, %v327_v17 }
  0xe0   :  { %v336_v25 = vsel %vm333_vm4, %v335_v22, %v331_v24 }
  0xe1   :  { %v359_v28 = vmul.f32 %v1503_v19, %v336_v25  ;;  %v1507_v35 = vpop.eup %1506  ;;  %v358_v40 = vmul.f32 0.0, %v336_v25 }
  0xe2   :  { %v344_v36 = vmul.f32 %v1507_v35, %v342_v33  ;;  %vm349_vm6 = vweird.f32 %v1507_v35 }
  0xe3   :  { %361 = vrot.lane.b32.xlu0 %v359_v28, %s1756_s2  ;;  %vm350_vm7 = vmor %vm348_vm5, %vm349_vm6 }
  0xe4   :  { %v345_v38 = vsub.f32 1.0, %v344_v36 }
  0xe6   :  { %v346_v39 = vmul.f32 %v1507_v35, %v345_v38 }
  0xe8   :  { %v347_v44 = vadd.f32 %v1507_v35, %v346_v39 }
  0xea   :  { %v351_v50 = vsel %vm350_vm7, %v1507_v35, %v347_v44 }
  0xeb   :  { %v356_v53 = vsel %vm353_vm8, %v355_v47, %v351_v50 }
 0x155   :  { %v362_v41 = vpop.permute.xlu0 %361 }
 0x156   :  { %v1969_v42 = vadd.f32 %v362_v41, %v358_v40 }
 0x158   :  { %1508 = vtanh.f32 %v1969_v42 }
 0x15e   :  { %v1509_v52 = vpop.eup %1508 }
 0x15f   :  { %v1972_v56 = vmul.f32 %v1509_v52, %v356_v53 }
 0x161   :  { %368 = vrot.lane.b32.xlu0 %v1972_v56, %s1756_s2 }
 0x1d3   :  { %v369_v58 = vpop.permute.xlu0 %368 }
 0x1d4   :  { %372 = vst.msk [vmem:[#allocation3] sm:$0xff] %vm371_vm9, %v369_v58  ;;  %1432 = vmatmul.msk.f32.vlgmr.msra.gmra.mxu2 %vm130_vm0, %v369_v58  ;;  %1433 = vmatmul.msk.f32.vlgmr.msra.gmra.mxu3 %vm130_vm0, %v369_v58 }
 0x1d5   :  { %652 = vmatpush.msra.mxu2 %v1815_v3  ;;  %672 = vmatpush.msra.mxu3 %v1843_v18 }
 0x1d7   :  { %653 = vmatpush.msra.mxu2 %v1818_v5  ;;  %673 = vmatpush.msra.mxu3 %v1848_v20 }
 0x1d9   :  { %654 = vmatpush.msra.mxu2 %v1821_v7  ;;  %674 = vmatpush.msra.mxu3 %v1854_v23 }
 0x1db   :  { %655 = vmatpush.msra.mxu2 %v1824_v9  ;;  %675 = vmatpush.msra.mxu3 %v1863_v27 }
 0x1dd   :  { %656 = vmatpush.msra.mxu2 %v1827_v11  ;;  %676 = vmatpush.msra.mxu3 %v1873_v30 }
 0x1df   :  { %657 = vmatpush.msra.mxu2 %v1834_v15  ;;  %677 = vmatpush.msra.mxu3 %v1879_v32 }
 0x1e1   :  { %658 = vmatpush.msra.mxu2 %v1852_v21  ;;  %678 = vmatpush.msra.mxu3 %v1883_v34 }
 0x1e3   :  { %659 = vmatpush.msra.mxu2 %v1861_v26  ;;  %679 = vmatpush.msra.mxu3 %v1889_v37 }
 0x257   :  { %v413_v59 = vpop.f32.mrf.mxu2  ;;  %v433_v4 = vpop.f32.mrf.mxu3 }
 0x258   :  { %v441_v60 = vadd.f32 %v413_v59, %v1953_v48  ;;  %v442_v8 = vadd.f32 %v433_v4, %v217_v2 }
 0x25a   :  { %v1434_v61 = vmul.f32 -1.442695, %v441_v60  ;;  %v1435_v28 = vmul.f32 -1.442695, %v442_v8 }
 0x25c   :  { %1510 = vpow2.f32 %v1434_v61 }
 0x262   :  { %v1511_v62 = vpop.eup %1510 }
 0x263   :  { %v446_v63 = vadd.f32 1.0, %v1511_v62 }
 0x265   :  { %1512 = vrcp.f32 %v446_v63  ;;  %v458_v13 = vand.u32 2147483648, %v446_v63  ;;  %v456_v16 = vand.u32 2147483647, %v446_v63  ;;  %vm452_vm11 = vweird.f32 %v446_v63 }
 0x266   :  { %1514 = vtanh.f32 %v442_v8 }
 0x267   :  { %v459_v48 = vor.u32 1.1754944e-38, %v458_v13  ;;  %vm457_vm13 = vcmp.eq.f32.partialorder %v456_v16, 8.507059e+37  ;;  %1516 = vpow2.f32 %v1435_v28 }
 0x26b   :  { %v1513_v6 = vpop.eup %1512 }
 0x26c   :  { %v448_v10 = vmul.f32 %v1513_v6, %v446_v63  ;;  %vm453_vm10 = vweird.f32 %v1513_v6  ;;  %v1515_v22 = vpop.eup %1514 }
 0x26d   :  { %vm454_vm12 = vmor %vm452_vm11, %vm453_vm10  ;;  %v1517_v29 = vpop.eup %1516 }
 0x26e   :  { %v449_v12 = vsub.f32 1.0, %v448_v10  ;;  %v466_v31 = vadd.f32 1.0, %v1517_v29 }
 0x270   :  { %v450_v14 = vmul.f32 %v1513_v6, %v449_v12  ;;  %1518 = vrcp.f32 %v466_v31  ;;  %v478_v44 = vand.u32 2147483648, %v466_v31  ;;  %vm472_vm15 = vweird.f32 %v466_v31 }
 0x271   :  { %v476_v46 = vand.u32 2147483647, %v466_v31 }
 0x272   :  { %v451_v17 = vadd.f32 %v1513_v6, %v450_v14  ;;  %v479_v50 = vor.u32 1.1754944e-38, %v478_v44 }
 0x273   :  { %vm477_vm2 = vcmp.eq.f32.partialorder %v476_v46, 8.507059e+37 }
 0x274   :  { %v455_v19 = vsel %vm454_vm12, %v1513_v6, %v451_v17 }
 0x275   :  { %v460_v24 = vsel %vm457_vm13, %v459_v48, %v455_v19 }
 0x276   :  { %v483_v25 = vmul.f32 %v1515_v22, %v460_v24  ;;  %v1519_v33 = vpop.eup %1518  ;;  %v482_v39 = vmul.f32 %v460_v24, %v1969_v42 }
 0x277   :  { %v468_v35 = vmul.f32 %v1519_v33, %v466_v31  ;;  %vm473_vm14 = vweird.f32 %v1519_v33 }
 0x278   :  { %485 = vrot.lane.b32.xlu1 %v483_v25, %s1756_s2  ;;  %vm474_vm1 = vmor %vm472_vm15, %vm473_vm14 }
 0x279   :  { %v469_v36 = vsub.f32 1.0, %v468_v35 }
 0x27b   :  { %v470_v38 = vmul.f32 %v1519_v33, %v469_v36 }
 0x27d   :  { %v471_v43 = vadd.f32 %v1519_v33, %v470_v38 }
 0x27f   :  { %v475_v47 = vsel %vm474_vm1, %v1519_v33, %v471_v43 }
 0x280   :  { %v480_v53 = vsel %vm477_vm2, %v479_v50, %v475_v47 }
 0x2ea   :  { %v486_v40 = vpop.permute.xlu1 %485 }
 0x2eb   :  { %v1999_v41 = vadd.f32 %v486_v40, %v482_v39 }
 0x2ed   :  { %1520 = vtanh.f32 %v1999_v41 }
 0x2f3   :  { %v1521_v52 = vpop.eup %1520 }
 0x2f4   :  { %v2002_v58 = vmul.f32 %v1521_v52, %v480_v53 }
 0x2f6   :  { %492 = vrot.lane.b32.xlu1 %v2002_v58, %s1756_s2 }
 0x368   :  { %v493_v42 = vpop.permute.xlu1 %492 }
 0x369   :  { %496 = vst.msk [vmem:[#allocation3 + $0x8] sm:$0xff] %vm371_vm9, %v493_v42  ;;  %1436 = vmatmul.msk.f32.vlgmr.msrb.gmra.mxu2 %vm130_vm0, %v493_v42  ;;  %1437 = vmatmul.msk.f32.vlgmr.msrb.gmra.mxu3 %vm130_vm0, %v493_v42 }
 0x36a   :  { %900 = vmatpush.msrb.mxu2 %v1815_v3  ;;  %920 = vmatpush.msrb.mxu3 %v1843_v18  ;;  %v219_v18 = vpop.f32.mrf.mxu1 }
 0x36c   :  { %901 = vmatpush.msrb.mxu2 %v1818_v5  ;;  %921 = vmatpush.msrb.mxu3 %v1848_v20 }
 0x36e   :  { %902 = vmatpush.msrb.mxu2 %v1821_v7  ;;  %922 = vmatpush.msrb.mxu3 %v1854_v23 }
 0x370   :  { %903 = vmatpush.msrb.mxu2 %v1824_v9  ;;  %923 = vmatpush.msrb.mxu3 %v1863_v27 }
 0x372   :  { %904 = vmatpush.msrb.mxu2 %v1827_v11  ;;  %924 = vmatpush.msrb.mxu3 %v1873_v30  ;;  %v222_v39 = vpop.f32.mrf.mxu1 }
 0x373   :  { %v223_v40 = vadd.f32 %v222_v39, %v1965_v0 }
 0x374   :  { %905 = vmatpush.msrb.mxu2 %v1834_v15  ;;  %925 = vmatpush.msrb.mxu3 %v1879_v32  ;;  %v220_v15 = vadd.f32 %v219_v18, %v1965_v0 }
 0x376   :  { %906 = vmatpush.msrb.mxu2 %v1852_v21  ;;  %926 = vmatpush.msrb.mxu3 %v1883_v34 }
 0x378   :  { %907 = vmatpush.msrb.mxu2 %v1861_v26  ;;  %927 = vmatpush.msrb.mxu3 %v1889_v37 }
 0x3ec   :  { %v537_v3 = vpop.f32.mrf.mxu2  ;;  %v557_v20 = vpop.f32.mrf.mxu3 }
 0x3ed   :  { %v565_v5 = vadd.f32 %v537_v3, %v1959_v54  ;;  %v566_v21 = vadd.f32 %v557_v20, %v220_v15 }
 0x3ef   :  { %v1438_v7 = vmul.f32 -1.442695, %v565_v5  ;;  %v1439_v63 = vmul.f32 -1.442695, %v566_v21 }
 0x3f1   :  { %1522 = vpow2.f32 %v1438_v7 }
 0x3f7   :  { %v1523_v9 = vpop.eup %1522 }
 0x3f8   :  { %v570_v11 = vadd.f32 1.0, %v1523_v9 }
 0x3fa   :  { %1524 = vrcp.f32 %v570_v11  ;;  %v582_v26 = vand.u32 2147483648, %v570_v11  ;;  %v580_v34 = vand.u32 2147483647, %v570_v11  ;;  %vm576_vm4 = vweird.f32 %v570_v11 }
 0x3fb   :  { %1526 = vtanh.f32 %v566_v21 }
 0x3fc   :  { %v583_v54 = vor.u32 1.1754944e-38, %v582_v26  ;;  %vm581_vm6 = vcmp.eq.f32.partialorder %v580_v34, 8.507059e+37  ;;  %1528 = vpow2.f32 %v1439_v63 }
 0x400   :  { %v1525_v23 = vpop.eup %1524 }
 0x401   :  { %v572_v27 = vmul.f32 %v1525_v23, %v570_v11  ;;  %vm577_vm3 = vweird.f32 %v1525_v23  ;;  %v1527_v60 = vpop.eup %1526 }
 0x402   :  { %vm578_vm5 = vmor %vm576_vm4, %vm577_vm3  ;;  %v1529_v1 = vpop.eup %1528 }
 0x403   :  { %v573_v30 = vsub.f32 1.0, %v572_v27  ;;  %v590_v2 = vadd.f32 1.0, %v1529_v1 }
 0x405   :  { %v574_v32 = vmul.f32 %v1525_v23, %v573_v30  ;;  %1530 = vrcp.f32 %v590_v2  ;;  %v602_v17 = vand.u32 2147483648, %v590_v2  ;;  %vm596_vm8 = vweird.f32 %v590_v2 }
 0x406   :  { %v600_v48 = vand.u32 2147483647, %v590_v2 }
 0x407   :  { %v575_v37 = vadd.f32 %v1525_v23, %v574_v32  ;;  %v603_v22 = vor.u32 1.1754944e-38, %v602_v17 }
 0x408   :  { %vm601_vm11 = vcmp.eq.f32.partialorder %v600_v48, 8.507059e+37 }
 0x409   :  { %v579_v59 = vsel %vm578_vm5, %v1525_v23, %v575_v37 }
 0x40a   :  { %v584_v61 = vsel %vm581_vm6, %v583_v54, %v579_v59 }
 0x40b   :  { %v607_v62 = vmul.f32 %v1527_v60, %v584_v61  ;;  %v1531_v4 = vpop.eup %1530  ;;  %v606_v12 = vmul.f32 %v584_v61, %v1999_v41 }
 0x40c   :  { %v592_v6 = vmul.f32 %v1531_v4, %v590_v2  ;;  %vm597_vm7 = vweird.f32 %v1531_v4  ;;  %v225_v2 = vpop.f32.mrf.mxu1 }
 0x40d   :  { %609 = vrot.lane.b32.xlu2 %v607_v62, %s1756_s2  ;;  %vm598_vm10 = vmor %vm596_vm8, %vm597_vm7  ;;  %v226_v48 = vadd.f32 %v225_v2, %v1965_v0 }
 0x40e   :  { %v593_v8 = vsub.f32 1.0, %v592_v6 }
 0x410   :  { %v594_v10 = vmul.f32 %v1531_v4, %v593_v8 }
 0x412   :  { %v595_v16 = vadd.f32 %v1531_v4, %v594_v10 }
 0x414   :  { %v599_v19 = vsel %vm598_vm10, %v1531_v4, %v595_v16  ;;  %v2046_v4 = vpop.f32.mrf.mxu1 }
 0x415   :  { %v604_v25 = vsel %vm601_vm11, %v603_v22, %v599_v19 }
 0x41c   :  { %v2048_v6 = vpop.f32.mrf.mxu1 }
 0x467   :  { %v610_v13 = vpop.permute.xlu2 %609 }
 0x468   :  { %v612_v14 = vadd.f32 %v610_v13, %v606_v12  ;;  %v2051_v13 = vpop.f32.mrf.mxu1 }
 0x46a   :  { %1532 = vtanh.f32 %v612_v14 }
 0x470   :  { %v1533_v24 = vpop.eup %1532 }
 0x471   :  { %v2029_v28 = vmul.f32 %v1533_v24, %v604_v25 }
 0x473   :  { %616 = vrot.lane.b32.xlu2 %v2029_v28, %s1756_s2 }
 0x4cd   :  { %v617_v29 = vpop.permute.xlu2 %616 }
 0x4ce   :  { %620 = vst.msk [vmem:[#allocation3 + $0x10] sm:$0xff] %vm371_vm9, %v617_v29  ;;  %1440 = vmatmul.msk.f32.vlgmr.msra.gmra.mxu2 %vm130_vm0, %v617_v29  ;;  %1441 = vmatmul.msk.f32.vlgmr.msra.gmra.mxu3 %vm130_vm0, %v617_v29 }
 0x551   :  { %v661_v31 = vpop.f32.mrf.mxu2  ;;  %v681_v41 = vpop.f32.mrf.mxu3 }
 0x552   :  { %v689_v33 = vadd.f32 %v661_v31, %v1951_v45  ;;  %v690_v44 = vadd.f32 %v681_v41, %v223_v40 }
 0x554   :  { %v1442_v35 = vmul.f32 -1.442695, %v689_v33  ;;  %v1443_v11 = vmul.f32 -1.442695, %v690_v44 }
 0x556   :  { %1534 = vpow2.f32 %v1442_v35 }
 0x55c   :  { %v1535_v36 = vpop.eup %1534 }
 0x55d   :  { %v694_v38 = vadd.f32 1.0, %v1535_v36 }
 0x55f   :  { %1536 = vrcp.f32 %v694_v38  ;;  %v706_v50 = vand.u32 2147483648, %v694_v38  ;;  %v704_v53 = vand.u32 2147483647, %v694_v38  ;;  %vm700_vm13 = vweird.f32 %v694_v38 }
 0x560   :  { %1538 = vtanh.f32 %v690_v44 }
 0x561   :  { %v707_v45 = vor.u32 1.1754944e-38, %v706_v50  ;;  %vm705_vm15 = vcmp.eq.f32.partialorder %v704_v53, 8.507059e+37  ;;  %1540 = vpow2.f32 %v1443_v11 }
 0x565   :  { %v1537_v43 = vpop.eup %1536 }
 0x566   :  { %v696_v46 = vmul.f32 %v1537_v43, %v694_v38  ;;  %vm701_vm12 = vweird.f32 %v1537_v43  ;;  %v1539_v5 = vpop.eup %1538 }
 0x567   :  { %vm702_vm14 = vmor %vm700_vm13, %vm701_vm12  ;;  %v1541_v18 = vpop.eup %1540 }
 0x568   :  { %v697_v47 = vsub.f32 1.0, %v696_v46  ;;  %v714_v15 = vadd.f32 1.0, %v1541_v18 }
 0x56a   :  { %v698_v52 = vmul.f32 %v1537_v43, %v697_v47  ;;  %1542 = vrcp.f32 %v714_v15  ;;  %v726_v37 = vand.u32 2147483648, %v714_v15  ;;  %vm720_vm2 = vweird.f32 %v714_v15 }
 0x56b   :  { %v724_v54 = vand.u32 2147483647, %v714_v15 }
 0x56c   :  { %v699_v42 = vadd.f32 %v1537_v43, %v698_v52  ;;  %v727_v60 = vor.u32 1.1754944e-38, %v726_v37  ;;  %v229_v37 = vadd.f32 %v2046_v4, %v1965_v0 }
 0x56d   :  { %vm725_vm4 = vcmp.eq.f32.partialorder %v724_v54, 8.507059e+37 }
 0x56e   :  { %v703_v3 = vsel %vm702_vm14, %v1537_v43, %v699_v42 }
 0x56f   :  { %v708_v7 = vsel %vm705_vm15, %v707_v45, %v703_v3 }
 0x570   :  { %v731_v9 = vmul.f32 %v1539_v5, %v708_v7  ;;  %v1543_v20 = vpop.eup %1542  ;;  %v730_v30 = vmul.f32 %v708_v7, %v612_v14 }
 0x571   :  { %v716_v23 = vmul.f32 %v1543_v20, %v714_v15  ;;  %vm721_vm1 = vweird.f32 %v1543_v20 }
 0x572   :  { %733 = vrot.lane.b32.xlu0 %v731_v9, %s1756_s2  ;;  %vm722_vm3 = vmor %vm720_vm2, %vm721_vm1 }
 0x573   :  { %v717_v21 = vsub.f32 1.0, %v716_v23 }
 0x575   :  { %v718_v27 = vmul.f32 %v1543_v20, %v717_v21 }
 0x577   :  { %v719_v34 = vadd.f32 %v1543_v20, %v718_v27 }
 0x579   :  { %v723_v59 = vsel %vm722_vm3, %v1543_v20, %v719_v34 }
 0x57a   :  { %v728_v62 = vsel %vm725_vm4, %v727_v60, %v723_v59 }
 0x5e4   :  { %v734_v26 = vpop.permute.xlu0 %733 }
 0x5e5   :  { %v736_v32 = vadd.f32 %v734_v26, %v730_v30 }
 0x5e7   :  { %1544 = vtanh.f32 %v736_v32 }
 0x5ed   :  { %v1545_v61 = vpop.eup %1544 }
 0x5ee   :  { %v2039_v63 = vmul.f32 %v1545_v61, %v728_v62 }
 0x5f0   :  { %740 = vrot.lane.b32.xlu1 %v2039_v63, %s1756_s2 }
 0x662   :  { %v741_v1 = vpop.permute.xlu1 %740 }
 0x663   :  { %744 = vst.msk [vmem:[#allocation3 + $0x18] sm:$0xff] %vm371_vm9, %v741_v1  ;;  %1444 = vmatmul.msk.f32.vlgmr.msra.gmra.mxu0 %vm130_vm0, %v741_v1  ;;  %1445 = vmatmul.msk.f32.vlgmr.msra.gmra.mxu1 %vm130_vm0, %v741_v1 }
 0x6e0   :  { %v785_v8 = vpop.f32.mrf.mxu0  ;;  %v805_v17 = vpop.f32.mrf.mxu1 }
 0x6e1   :  { %v813_v10 = vadd.f32 %v785_v8, %v1957_v51  ;;  %v814_v22 = vadd.f32 %v805_v17, %v226_v48 }
 0x6e3   :  { %v1446_v12 = vmul.f32 -1.442695, %v813_v10  ;;  %v1447_v41 = vmul.f32 -1.442695, %v814_v22 }
 0x6e5   :  { %1546 = vpow2.f32 %v1446_v12 }
 0x6eb   :  { %v1547_v14 = vpop.eup %1546 }
 0x6ec   :  { %v818_v16 = vadd.f32 1.0, %v1547_v14 }
 0x6ee   :  { %1548 = vrcp.f32 %v818_v16  ;;  %v830_v29 = vand.u32 2147483648, %v818_v16  ;;  %v828_v33 = vand.u32 2147483647, %v818_v16  ;;  %vm824_vm6 = vweird.f32 %v818_v16 }
 0x6ef   :  { %1550 = vtanh.f32 %v814_v22  ;;  %v1013_v22 = vld [vmem:[#allocation11 + $0x78] sm:$0xff] }
 0x6f0   :  { %v831_v35 = vor.u32 1.1754944e-38, %v830_v29  ;;  %vm829_vm8 = vcmp.eq.f32.partialorder %v828_v33, 8.507059e+37  ;;  %1552 = vpow2.f32 %v1447_v41  ;;  %1044 = vmatpush.msrb.mxu1 %v1013_v22  ;;  %v1008_v29 = vld [vmem:[#allocation11 + $0x50] sm:$0xff]  ;;  %1168 = vmatpush.msra.mxu3 %v1013_v22  ;;  %v1006_v33 = vld [vmem:[#allocation11 + $0x40] sm:$0xff] }
 0x6f4   :  { %v1549_v19 = vpop.eup %1548 }
 0x6f5   :  { %v820_v24 = vmul.f32 %v1549_v19, %v818_v16  ;;  %vm825_vm5 = vweird.f32 %v1549_v19  ;;  %v1551_v38 = vpop.eup %1550 }
 0x6f6   :  { %vm826_vm7 = vmor %vm824_vm6, %vm825_vm5  ;;  %v1553_v43 = vpop.eup %1552 }
 0x6f7   :  { %v821_v25 = vsub.f32 1.0, %v820_v24  ;;  %v838_v44 = vadd.f32 1.0, %v1553_v43  ;;  %v1010_v24 = vld [vmem:[#allocation11 + $0x60] sm:$0xff]  ;;  %v1000_v43 = vld [vmem:[#allocation11 + $0x10] sm:$0xff] }
 0x6f9   :  { %v822_v31 = vmul.f32 %v1549_v19, %v821_v25  ;;  %1554 = vrcp.f32 %v838_v44  ;;  %v850_v5 = vand.u32 2147483648, %v838_v44  ;;  %vm844_vm11 = vweird.f32 %v838_v44  ;;  %v1011_v25 = vld [vmem:[#allocation11 + $0x68] sm:$0xff] }
 0x6fa   :  { %v848_v7 = vand.u32 2147483647, %v838_v44  ;;  %1045 = vmatpush.msrb.mxu1 %v1011_v25  ;;  %1169 = vmatpush.msra.mxu3 %v1011_v25 }
 0x6fb   :  { %v823_v51 = vadd.f32 %v1549_v19, %v822_v31  ;;  %v851_v11 = vor.u32 1.1754944e-38, %v850_v5  ;;  %v1009_v31 = vld [vmem:[#allocation11 + $0x58] sm:$0xff] }
 0x6fc   :  { %vm849_vm13 = vcmp.eq.f32.partialorder %v848_v7, 8.507059e+37  ;;  %1046 = vmatpush.msrb.mxu1 %v1009_v31  ;;  %1170 = vmatpush.msra.mxu3 %v1009_v31 }
 0x6fd   :  { %v827_v36 = vsel %vm826_vm7, %v1549_v19, %v823_v51  ;;  %v1012_v19 = vld [vmem:[#allocation11 + $0x70] sm:$0xff]  ;;  %v1007_v51 = vld [vmem:[#allocation11 + $0x48] sm:$0xff] }
 0x6fe   :  { %v832_v39 = vsel %vm829_vm8, %v831_v35, %v827_v36  ;;  %1024 = vmatpush.msrb.mxu0 %v1012_v19  ;;  %1148 = vmatpush.msra.mxu2 %v1012_v19  ;;  %v1004_v35 = vld [vmem:[#allocation11 + $0x30] sm:$0xff]  ;;  %v1005_v36 = vld [vmem:[#allocation11 + $0x38] sm:$0xff] }
 0x6ff   :  { %v855_v40 = vmul.f32 %v1551_v38, %v832_v39  ;;  %v1555_v46 = vpop.eup %1554  ;;  %v854_v53 = vmul.f32 %v832_v39, %v736_v32  ;;  %1047 = vmatpush.msrb.mxu1 %v1007_v51  ;;  %v1002_v39 = vld [vmem:[#allocation11 + $0x20] sm:$0xff]  ;;  %1171 = vmatpush.msra.mxu3 %v1007_v51 }
 0x700   :  { %v840_v47 = vmul.f32 %v1555_v46, %v838_v44  ;;  %vm845_vm10 = vweird.f32 %v1555_v46  ;;  %1025 = vmatpush.msrb.mxu0 %v1010_v24  ;;  %1149 = vmatpush.msra.mxu2 %v1010_v24  ;;  %v1001_v44 = vld [vmem:[#allocation11 + $0x18] sm:$0xff] }
 0x701   :  { %857 = vrot.lane.b32.xlu2 %v855_v40, %s1756_s2  ;;  %vm846_vm12 = vmor %vm844_vm11, %vm845_vm10  ;;  %v1003_v40 = vld [vmem:[#allocation11 + $0x28] sm:$0xff]  ;;  %1048 = vmatpush.msrb.mxu1 %v1005_v36 }
 0x702   :  { %v841_v50 = vsub.f32 1.0, %v840_v47  ;;  %1026 = vmatpush.msrb.mxu0 %v1008_v29  ;;  %1150 = vmatpush.msra.mxu2 %v1008_v29  ;;  %v999_v47 = vld [vmem:[#allocation11 + $0x8] sm:$0xff] }
 0x703   :  { %1172 = vmatpush.msra.mxu3 %v1005_v36  ;;  %1049 = vmatpush.msrb.mxu1 %v1003_v40 }
 0x704   :  { %v842_v52 = vmul.f32 %v1555_v46, %v841_v50  ;;  %1027 = vmatpush.msrb.mxu0 %v1006_v33  ;;  %1151 = vmatpush.msra.mxu2 %v1006_v33 }
 0x705   :  { %1173 = vmatpush.msra.mxu3 %v1003_v40  ;;  %1050 = vmatpush.msrb.mxu1 %v1001_v44 }
 0x706   :  { %v843_v3 = vadd.f32 %v1555_v46, %v842_v52  ;;  %1028 = vmatpush.msrb.mxu0 %v1004_v35  ;;  %1152 = vmatpush.msra.mxu2 %v1004_v35 }
 0x707   :  { %1174 = vmatpush.msra.mxu3 %v1001_v44  ;;  %1051 = vmatpush.msrb.mxu1 %v999_v47 }
 0x708   :  { %v847_v9 = vsel %vm846_vm12, %v1555_v46, %v843_v3  ;;  %1029 = vmatpush.msrb.mxu0 %v1002_v39  ;;  %v998_v46 = vld [vmem:[#allocation11] sm:$0xff]  ;;  %1153 = vmatpush.msra.mxu2 %v1002_v39 }
 0x709   :  { %v852_v15 = vsel %vm849_vm13, %v851_v11, %v847_v9  ;;  %1175 = vmatpush.msra.mxu3 %v999_v47 }
 0x70a   :  { %1030 = vmatpush.msrb.mxu0 %v1000_v43  ;;  %1154 = vmatpush.msra.mxu2 %v1000_v43 }
 0x70c   :  { %1031 = vmatpush.msrb.mxu0 %v998_v46  ;;  %1155 = vmatpush.msra.mxu2 %v998_v46 }
 0x75b   :  { %v858_v42 = vpop.permute.xlu2 %857 }
 0x75c   :  { %v2055_v45 = vadd.f32 %v858_v42, %v854_v53 }
 0x75e   :  { %1556 = vtanh.f32 %v2055_v45 }
 0x764   :  { %v1557_v18 = vpop.eup %1556 }
 0x765   :  { %v2058_v20 = vmul.f32 %v1557_v18, %v852_v15 }
 0x767   :  { %864 = vrot.lane.b32.xlu0 %v2058_v20, %s1756_s2 }
 0x7d9   :  { %v865_v23 = vpop.permute.xlu0 %864 }
 0x7da   :  { %868 = vst.msk [vmem:[#allocation3 + $0x20] sm:$0xff] %vm371_vm9, %v865_v23  ;;  %1448 = vmatmul.msk.f32.vlgmr.msrb.gmra.mxu2 %vm130_vm0, %v865_v23  ;;  %1449 = vmatmul.msk.f32.vlgmr.msrb.gmra.mxu3 %vm130_vm0, %v865_v23 }
 0x85d   :  { %v909_v21 = vpop.f32.mrf.mxu2  ;;  %v929_v34 = vpop.f32.mrf.mxu3 }
 0x85e   :  { %v937_v27 = vadd.f32 %v909_v21, %v1963_v57  ;;  %v938_v59 = vadd.f32 %v929_v34, %v229_v37 }
 0x860   :  { %v1450_v30 = vmul.f32 -1.442695, %v937_v27  ;;  %v1451_v4 = vmul.f32 -1.442695, %v938_v59 }
 0x862   :  { %1558 = vpow2.f32 %v1450_v30 }
 0x868   :  { %v1559_v26 = vpop.eup %1558 }
 0x869   :  { %v942_v32 = vadd.f32 1.0, %v1559_v26 }
 0x86b   :  { %1560 = vrcp.f32 %v942_v32  ;;  %v954_v62 = vand.u32 2147483648, %v942_v32  ;;  %v952_v2 = vand.u32 2147483647, %v942_v32  ;;  %vm948_vm15 = vweird.f32 %v942_v32 }
 0x86c   :  { %1562 = vtanh.f32 %v938_v59 }
 0x86d   :  { %v955_v57 = vor.u32 1.1754944e-38, %v954_v62  ;;  %vm953_vm2 = vcmp.eq.f32.partialorder %v952_v2, 8.507059e+37  ;;  %1564 = vpow2.f32 %v1451_v4 }
 0x871   :  { %v1561_v54 = vpop.eup %1560 }
 0x872   :  { %v944_v60 = vmul.f32 %v1561_v54, %v942_v32  ;;  %vm949_vm14 = vweird.f32 %v1561_v54  ;;  %v1563_v12 = vpop.eup %1562 }
 0x873   :  { %vm950_vm1 = vmor %vm948_vm15, %vm949_vm14  ;;  %v1565_v17 = vpop.eup %1564 }
 0x874   :  { %v945_v61 = vsub.f32 1.0, %v944_v60  ;;  %v2069_v48 = vadd.f32 1.0, %v1565_v17 }
 0x876   :  { %v946_v1 = vmul.f32 %v1561_v54, %v945_v61  ;;  %1566 = vrcp.f32 %v2069_v48  ;;  %v974_v7 = vand.u32 2147483648, %v2069_v48  ;;  %vm968_vm4 = vweird.f32 %v2069_v48 }
 0x877   :  { %v972_v9 = vand.u32 2147483647, %v2069_v48 }
 0x878   :  { %v947_v8 = vadd.f32 %v1561_v54, %v946_v1  ;;  %v975_v18 = vor.u32 1.1754944e-38, %v974_v7 }
 0x879   :  { %vm973_vm6 = vcmp.eq.f32.partialorder %v972_v9, 8.507059e+37 }
 0x87a   :  { %v951_v10 = vsel %vm950_vm1, %v1561_v54, %v947_v8  ;;  %v232_v54 = vadd.f32 %v2048_v6, %v1965_v0 }
 0x87b   :  { %v956_v14 = vsel %vm953_vm2, %v955_v57, %v951_v10 }
 0x87c   :  { %v979_v16 = vmul.f32 %v1563_v12, %v956_v14  ;;  %v1567_v38 = vpop.eup %1566  ;;  %v978_v53 = vmul.f32 %v956_v14, %v2055_v45 }
 0x87d   :  { %v964_v41 = vmul.f32 %v1567_v38, %v2069_v48  ;;  %vm969_vm3 = vweird.f32 %v1567_v38 }
 0x87e   :  { %981 = vrot.lane.b32.xlu1 %v979_v16, %s1756_s2  ;;  %vm970_vm5 = vmor %vm968_vm4, %vm969_vm3 }
 0x87f   :  { %v965_v50 = vsub.f32 1.0, %v964_v41 }
 0x881   :  { %v966_v52 = vmul.f32 %v1567_v38, %v965_v50 }
 0x883   :  { %v967_v5 = vadd.f32 %v1567_v38, %v966_v52 }
 0x885   :  { %v971_v11 = vsel %vm970_vm5, %v1567_v38, %v967_v5 }
 0x886   :  { %v976_v23 = vsel %vm973_vm6, %v975_v18, %v971_v11 }
 0x8f0   :  { %v982_v42 = vpop.permute.xlu1 %981 }
 0x8f1   :  { %v984_v3 = vadd.f32 %v982_v42, %v978_v53 }
 0x8f3   :  { %1568 = vtanh.f32 %v984_v3 }
 0x8f9   :  { %v1569_v15 = vpop.eup %1568 }
 0x8fa   :  { %v2077_v21 = vmul.f32 %v1569_v15, %v976_v23 }
 0x8fc   :  { %988 = vrot.lane.b32.xlu2 %v2077_v21, %s1756_s2 }
 0x956   :  { %v989_v45 = vpop.permute.xlu2 %988 }
 0x957   :  { %992 = vst.msk [vmem:[#allocation3 + $0x28] sm:$0xff] %vm371_vm9, %v989_v45  ;;  %1452 = vmatmul.msk.f32.vlgmr.msrb.gmra.mxu0 %vm130_vm0, %v989_v45  ;;  %1453 = vmatmul.msk.f32.vlgmr.msrb.gmra.mxu1 %vm130_vm0, %v989_v45 }
 0x9d4   :  { %v1033_v27 = vpop.f32.mrf.mxu0  ;;  %v1053_v37 = vpop.f32.mrf.mxu1 }
 0x9d5   :  { %v1061_v30 = vadd.f32 %v1033_v27, %v1955_v49  ;;  %v1062_v60 = vadd.f32 %v1053_v37, %v232_v54 }
 0x9d7   :  { %v1454_v26 = vmul.f32 -1.442695, %v1061_v30  ;;  %v1455_v6 = vmul.f32 -1.442695, %v1062_v60 }
 0x9d9   :  { %1570 = vpow2.f32 %v1454_v26 }
 0x9df   :  { %v1571_v32 = vpop.eup %1570 }
 0x9e0   :  { %v1066_v34 = vadd.f32 1.0, %v1571_v32 }
 0x9e2   :  { %1572 = vrcp.f32 %v1066_v34  ;;  %v1078_v1 = vand.u32 2147483648, %v1066_v34  ;;  %v1076_v8 = vand.u32 2147483647, %v1066_v34  ;;  %vm1072_vm8 = vweird.f32 %v1066_v34 }
 0x9e3   :  { %1574 = vtanh.f32 %v1062_v60 }
 0x9e4   :  { %v1079_v49 = vor.u32 1.1754944e-38, %v1078_v1  ;;  %vm1077_vm11 = vcmp.eq.f32.partialorder %v1076_v8, 8.507059e+37  ;;  %1576 = vpow2.f32 %v1455_v6 }
 0x9e8   :  { %v1573_v59 = vpop.eup %1572 }
 0x9e9   :  { %v1068_v61 = vmul.f32 %v1573_v59, %v1066_v34  ;;  %vm1073_vm7 = vweird.f32 %v1573_v59  ;;  %v1575_v12 = vpop.eup %1574 }
 0x9ea   :  { %vm1074_vm10 = vmor %vm1072_vm8, %vm1073_vm7  ;;  %v1577_v4 = vpop.eup %1576 }
 0x9eb   :  { %v1069_v62 = vsub.f32 1.0, %v1068_v61  ;;  %v1086_v17 = vadd.f32 1.0, %v1577_v4 }
 0x9ed   :  { %v1070_v2 = vmul.f32 %v1573_v59, %v1069_v62  ;;  %1578 = vrcp.f32 %v1086_v17  ;;  %v1098_v51 = vand.u32 2147483648, %v1086_v17  ;;  %vm1092_vm13 = vweird.f32 %v1086_v17 }
 0x9ee   :  { %v1096_v35 = vand.u32 2147483647, %v1086_v17 }
 0x9ef   :  { %v1071_v57 = vadd.f32 %v1573_v59, %v1070_v2  ;;  %v1099_v38 = vor.u32 1.1754944e-38, %v1098_v51  ;;  %v1305_v51 = vld [vmem:[#allocation13 + $0x20] sm:$0xff] }
 0x9f0   :  { %vm1097_vm15 = vcmp.eq.f32.partialorder %v1096_v35, 8.507059e+37  ;;  %v1304_v35 = vld [vmem:[#allocation13 + $0x18] sm:$0xff] }
 0x9f1   :  { %v1075_v10 = vsel %vm1074_vm10, %v1573_v59, %v1071_v57 }
 0x9f2   :  { %v1080_v14 = vsel %vm1077_vm11, %v1079_v49, %v1075_v10 }
 0x9f3   :  { %v1103_v16 = vmul.f32 %v1575_v12, %v1080_v14  ;;  %v1579_v48 = vpop.eup %1578  ;;  %v1102_v25 = vmul.f32 %v1080_v14, %v984_v3  ;;  %v235_v3 = vadd.f32 %v2051_v13, %v1965_v0 }
 0x9f4   :  { %v1088_v19 = vmul.f32 %v1579_v48, %v1086_v17  ;;  %vm1093_vm12 = vweird.f32 %v1579_v48 }
 0x9f5   :  { %1105 = vrot.lane.b32.xlu0 %v1103_v16, %s1756_s2  ;;  %vm1094_vm14 = vmor %vm1092_vm13, %vm1093_vm12 }
 0x9f6   :  { %v1089_v22 = vsub.f32 1.0, %v1088_v19 }
 0x9f8   :  { %v1090_v24 = vmul.f32 %v1579_v48, %v1089_v22 }
 0x9fa   :  { %v1091_v33 = vadd.f32 %v1579_v48, %v1090_v24 }
 0x9fc   :  { %v1095_v36 = vsel %vm1094_vm14, %v1579_v48, %v1091_v33  ;;  %v1306_v33 = vld [vmem:[#allocation13 + $0x28] sm:$0xff] }
 0x9fd   :  { %v1100_v40 = vsel %vm1097_vm15, %v1099_v38, %v1095_v36  ;;  %v1302_v36 = vld [vmem:[#allocation13 + $0x8] sm:$0xff]  ;;  %v1301_v38 = vld [vmem:[#allocation13] sm:$0xff] }
 0xa67   :  { %v1106_v29 = vpop.permute.xlu0 %1105 }
 0xa68   :  { %v2088_v31 = vadd.f32 %v1106_v29, %v1102_v25  ;;  %v1308_v29 = vld [vmem:[#allocation13 + $0x38] sm:$0xff] }
 0xa69   :  { %1345 = vmatpush.msra.mxu0 %v1308_v29 }
 0xa6a   :  { %1580 = vtanh.f32 %v2088_v31 }
 0xa70   :  { %v1581_v39 = vpop.eup %1580 }
 0xa71   :  { %v1110_v41 = vmul.f32 %v1581_v39, %v1100_v40 }
 0xa73   :  { %1112 = vrot.lane.b32.xlu1 %v1110_v41, %s1756_s2 }
 0xa7b   :  { %1117 = vrot.lane.b32.xlu1 %v1110_v41, %s1757_s4 }
 0xa83   :  { %745 = vrot.lane.b32.xlu1 %v2039_v63, %s1757_s4 }
 0xa8b   :  { %497 = vrot.lane.b32.xlu1 %v2002_v58, %s1757_s4 }
 0xae5   :  { %v1113_v43 = vpop.permute.xlu1 %1112 }
 0xae6   :  { %1116 = vst.msk [vmem:[#allocation3 + $0x30] sm:$0xff] %vm371_vm9, %v1113_v43  ;;  %1456 = vmatmul.msk.f32.vlgmr.msra.gmra.mxu2 %vm130_vm0, %v1113_v43  ;;  %1457 = vmatmul.msk.f32.vlgmr.msra.gmra.mxu3 %vm130_vm0, %v1113_v43 }
 0xaed   :  { %v1118_v44 = vpop.permute.xlu1 %1117 }
 0xaee   :  { %1121 = vst.msk [vmem:[#allocation4 + $0x8] sm:$0xff] %vm371_vm9, %v1118_v44  ;;  %v1245_v44 = vld [vmem:[#allocation3] sm:$0xff] }
 0xaf5   :  { %v746_v46 = vpop.permute.xlu1 %745  ;;  %v1254_v0 = vld [vmem:[#allocation4 + $0x8] sm:$0xff] }
 0xaf6   :  { %749 = vst.msk [vmem:[#allocation4 + $0x20] sm:$0xff] %vm371_vm9, %v746_v46 }
 0xafd   :  { %v498_v47 = vpop.permute.xlu1 %497  ;;  %v1257_v25 = vld [vmem:[#allocation4 + $0x20] sm:$0xff] }
 0xafe   :  { %501 = vst.msk [vmem:[#allocation4 + $0x30] sm:$0xff] %vm371_vm9, %v498_v47 }
 0xb69   :  { %v1157_v63 = vpop.f32.mrf.mxu2  ;;  %v1177_v42 = vpop.f32.mrf.mxu3 }
 0xb6a   :  { %v1185_v50 = vadd.f32 %v1157_v63, %v1961_v55  ;;  %v1186_v7 = vadd.f32 %v1177_v42, %v235_v3  ;;  %v1246_v63 = vld [vmem:[#allocation3 + $0x8] sm:$0xff]  ;;  %v1248_v3 = vld [vmem:[#allocation3 + $0x18] sm:$0xff] }
 0xb6c   :  { %v1458_v58 = vmul.f32 -1.442695, %v1185_v50  ;;  %v1459_v13 = vmul.f32 -1.442695, %v1186_v7 }
 0xb6e   :  { %1582 = vpow2.f32 %v1458_v58 }
 0xb74   :  { %v1583_v52 = vpop.eup %1582 }
 0xb75   :  { %v1190_v53 = vadd.f32 1.0, %v1583_v52 }
 0xb77   :  { %1584 = vrcp.f32 %v1190_v53  ;;  %v1202_v18 = vand.u32 2147483648, %v1190_v53  ;;  %v1200_v23 = vand.u32 2147483647, %v1190_v53  ;;  %vm1196_vm2 = vweird.f32 %v1190_v53 }
 0xb78   :  { %1586 = vtanh.f32 %v1186_v7 }
 0xb79   :  { %v1203_v55 = vor.u32 1.1754944e-38, %v1202_v18  ;;  %vm1201_vm4 = vcmp.eq.f32.partialorder %v1200_v23, 8.507059e+37  ;;  %1588 = vpow2.f32 %v1459_v13 }
 0xb7d   :  { %v1585_v5 = vpop.eup %1584 }
 0xb7e   :  { %v1192_v9 = vmul.f32 %v1585_v5, %v1190_v53  ;;  %vm1197_vm1 = vweird.f32 %v1585_v5  ;;  %v1587_v30 = vpop.eup %1586  ;;  %v1247_v53 = vld [vmem:[#allocation3 + $0x10] sm:$0xff] }
 0xb7f   :  { %vm1198_vm3 = vmor %vm1196_vm2, %vm1197_vm1  ;;  %v1589_v34 = vpop.eup %1588 }
 0xb80   :  { %v1193_v11 = vsub.f32 1.0, %v1192_v9  ;;  %v1210_v37 = vadd.f32 1.0, %v1589_v34  ;;  %v1249_v9 = vld [vmem:[#allocation3 + $0x20] sm:$0xff] }
 0xb82   :  { %v1194_v15 = vmul.f32 %v1585_v5, %v1193_v11  ;;  %1590 = vrcp.f32 %v1210_v37  ;;  %vm1216_vm6 = vweird.f32 %v1210_v37  ;;  %v1220_v8 = vand.u32 2147483647, %v1210_v37 }
 0xb84   :  { %v1195_v45 = vadd.f32 %v1585_v5, %v1194_v15  ;;  %vm1221_vm8 = vcmp.eq.f32.partialorder %v1220_v8, 8.507059e+37  ;;  %v1250_v15 = vld [vmem:[#allocation3 + $0x28] sm:$0xff] }
 0xb86   :  { %v1199_v27 = vsel %vm1198_vm3, %v1585_v5, %v1195_v45 }
 0xb87   :  { %v1204_v26 = vsel %vm1201_vm4, %v1203_v55, %v1199_v27  ;;  %v1251_v55 = vld [vmem:[#allocation3 + $0x30] sm:$0xff] }
 0xb88   :  { %v1227_v32 = vmul.f32 %v1587_v30, %v1204_v26  ;;  %v1591_v54 = vpop.eup %1590  ;;  %v1226_v62 = vmul.f32 %v1204_v26, %v2088_v31  ;;  %v1307_v31 = vld [vmem:[#allocation13 + $0x30] sm:$0xff]  ;;  %v1497_v30 = vld [vmem:[%s2162_s5] ss:$0 sm:$0xff]  ;;  %s1758_s5 = smov [#allocation14]  }
 0xb89   :  { %v1212_v59 = vmul.f32 %v1591_v54, %v1210_v37  ;;  %vm1217_vm5 = vweird.f32 %v1591_v54  ;;  %1346 = vmatpush.msra.mxu0 %v1307_v31  ;;  %s1390_s25 = sshll.u32 %s1758_s5, 4  ;;  %s1391_s25 = int_to_ptr.vmem [resolvable:$true] %s1390_s25 }
 0xb8a   :  { %1229 = vrot.lane.b32.xlu2 %v1227_v32, %s1756_s2  ;;  %vm1218_vm7 = vmor %vm1216_vm6, %vm1217_vm5 }
 0xb8b   :  { %v1213_v60 = vsub.f32 1.0, %v1212_v59  ;;  %1347 = vmatpush.msra.mxu0 %v1306_v33 }
 0xb8d   :  { %v1214_v61 = vmul.f32 %v1591_v54, %v1213_v60  ;;  %1348 = vmatpush.msra.mxu0 %v1305_v51 }
 0xb8f   :  { %1349 = vmatpush.msra.mxu0 %v1304_v35 }
 0xb92   :  { %993 = vrot.lane.b32.xlu2 %v2077_v21, %s1757_s4  ;;  %v1215_v21 = vadd.f32 %v1591_v54, %v1214_v61 }
 0xb94   :  { %v1219_v57 = vsel %vm1218_vm7, %v1591_v54, %v1215_v21 }
 0xb9a   :  { %621 = vrot.lane.b32.xlu2 %v2029_v28, %s1757_s4  ;;  %v1222_v28 = vand.u32 2147483648, %v1210_v37 }
 0xb9c   :  { %v1223_v49 = vor.u32 1.1754944e-38, %v1222_v28 }
 0xb9e   :  { %v1224_v14 = vsel %vm1221_vm8, %v1223_v49, %v1219_v57 }
 0xba2   :  { %1271 = vrot.lane.b32.xlu2 %v1254_v0, %s1757_s4 }
 0xbe4   :  { %v1230_v1 = vpop.permute.xlu2 %1229 }
 0xbe5   :  { %v1232_v2 = vadd.f32 %v1230_v1, %v1226_v62 }
 0xbe7   :  { %1592 = vtanh.f32 %v1232_v2 }
 0xbec   :  { %v994_v10 = vpop.permute.xlu2 %993 }
 0xbed   :  { %v1593_v12 = vpop.eup %1592  ;;  %997 = vst.msk [vmem:[#allocation4 + $0x10] sm:$0xff] %vm371_vm9, %v994_v10 }
 0xbee   :  { %v1234_v16 = vmul.f32 %v1593_v12, %v1224_v14 }
 0xbf0   :  { %1241 = vrot.lane.b32.xlu0 %v1234_v16, %s1757_s4 }
 0xbf4   :  { %v622_v6 = vpop.permute.xlu2 %621  ;;  %v1255_v4 = vld [vmem:[#allocation4 + $0x10] sm:$0xff] }
 0xbf5   :  { %625 = vst.msk [vmem:[#allocation4 + $0x28] sm:$0xff] %vm371_vm9, %v622_v6  ;;  %1273 = vrot.lane.b32.xlu1 %v1255_v4, %s1757_s4 }
 0xbf8   :  { %869 = vrot.lane.b32.xlu0 %v2058_v20, %s1757_s4  ;;  %v1259_v20 = vld [vmem:[#allocation4 + $0x30] sm:$0xff] }
 0xbfc   :  { %v1258_v17 = vld [vmem:[#allocation4 + $0x28] sm:$0xff]  ;;  %v1272_v39 = vpop.permute.xlu2 %1271 }
 0xbfd   :  { %1279 = vrot.lane.b32.xlu1 %v1258_v17, %s1757_s4  ;;  %v1294_v50 = vsel %vm371_vm9, %v1246_v63, %v1272_v39 }
 0xc62   :  { %v1242_v48 = vpop.permute.xlu0 %1241 }
 0xc63   :  { %1244 = vst.msk [vmem:[#allocation4] sm:$0xff] %vm371_vm9, %v1242_v48 }
 0xc67   :  { %v1274_v58 = vpop.permute.xlu1 %1273 }
 0xc68   :  { %v1295_v42 = vsel %vm371_vm9, %v1247_v53, %v1274_v58 }
 0xc6a   :  { %v870_v19 = vpop.permute.xlu0 %869  ;;  %v1253_v22 = vld [vmem:[#allocation4] sm:$0xff] }
 0xc6b   :  { %873 = vst.msk [vmem:[#allocation4 + $0x18] sm:$0xff] %vm371_vm9, %v870_v19  ;;  %1269 = vrot.lane.b32.xlu0 %v1253_v22, %s1757_s4 }
 0xc6f   :  { %v1280_v18 = vpop.permute.xlu1 %1279 }
 0xc70   :  { %v1298_v23 = vsel %vm371_vm9, %v1250_v15, %v1280_v18 }
 0xc72   :  { %v1256_v24 = vld [vmem:[#allocation4 + $0x18] sm:$0xff] }
 0xc73   :  { %373 = vrot.lane.b32.xlu0 %v1972_v56, %s1757_s4  ;;  %1275 = vrot.lane.b32.xlu2 %v1256_v24, %s1757_s4  ;;  %v1303_v56 = vld [vmem:[#allocation13 + $0x10] sm:$0xff] }
 0xc74   :  { %1350 = vmatpush.msra.mxu0 %v1303_v56 }
 0xc76   :  { %1351 = vmatpush.msra.mxu0 %v1302_v36 }
 0xc78   :  { %1352 = vmatpush.msra.mxu0 %v1301_v38 }
 0xc7b   :  { %1236 = vrot.lane.b32.xlu2 %v1234_v16, %s1756_s2  ;;  %1277 = vrot.lane.b32.xlu0 %v1257_v25, %s1757_s4 }
 0xc83   :  { %1281 = vrot.lane.b32.xlu0 %v1259_v20, %s1757_s4 }
 0xccd   :  { %v1276_v40 = vpop.permute.xlu2 %1275 }
 0xcce   :  { %v1296_v5 = vsel %vm371_vm9, %v1248_v3, %v1276_v40 }
 0xcd5   :  { %v1237_v41 = vpop.permute.xlu2 %1236 }
 0xcd6   :  { %1240 = vst.msk [vmem:[#allocation3 + $0x38] sm:$0xff] %vm371_vm9, %v1237_v41 }
 0xcdd   :  { %v1270_v43 = vpop.permute.xlu0 %1269  ;;  %v1252_v13 = vld [vmem:[#allocation3 + $0x38] sm:$0xff] }
 0xcde   :  { %v1293_v46 = vsel %vm371_vm9, %v1245_v44, %v1270_v43 }
 0xcdf   :  { %1460 = vmatmul.msk.f32.vlgmr.msra.gmra.mxu0 %vm130_vm0, %v1293_v46 }
 0xce5   :  { %v374_v47 = vpop.permute.xlu0 %373 }
 0xce6   :  { %377 = vst.msk [vmem:[#allocation4 + $0x38] sm:$0xff] %vm371_vm9, %v374_v47 }
 0xce7   :  { %1461 = vmatmul.msk.f32.gmra.mxu0 %vm130_vm0, %v1294_v50 }
 0xced   :  { %v1260_v52 = vld [vmem:[#allocation4 + $0x38] sm:$0xff]  ;;  %v1278_v7 = vpop.permute.xlu0 %1277 }
 0xcee   :  { %1283 = vrot.lane.b32.xlu1 %v1260_v52, %s1757_s4  ;;  %v1297_v11 = vsel %vm371_vm9, %v1249_v9, %v1278_v7 }
 0xcef   :  { %1462 = vmatmul.msk.f32.gmra.mxu0 %vm130_vm0, %v1295_v42 }
 0xcf5   :  { %v1282_v45 = vpop.permute.xlu0 %1281 }
 0xcf6   :  { %v1299_v27 = vsel %vm371_vm9, %v1251_v55, %v1282_v45 }
 0xcf7   :  { %1463 = vmatmul.msk.f32.gmra.mxu0 %vm130_vm0, %v1296_v5 }
 0xcff   :  { %1464 = vmatmul.msk.f32.gmra.mxu0 %vm130_vm0, %v1297_v11 }
 0xd07   :  { %1465 = vmatmul.msk.f32.gmra.mxu0 %vm130_vm0, %v1298_v23 }
 0xd0f   :  { %1466 = vmatmul.msk.f32.gmra.mxu0 %vm130_vm0, %v1299_v27 }
 0xd5c   :  { %v1354_v26 = vpop.f32.mrf.mxu0 }
 0xd5d   :  { %v1355_v32 = vadd.f32 %v1497_v30, %v1354_v26 }
 0xd5f   :  { %1378 = vst [vmem:[#allocation14] sm:$0xff] %v1355_v32 }
 0xd60   :  { %v1284_v0 = vpop.permute.xlu1 %1283 }
 0xd61   :  { %v1300_v34 = vsel %vm371_vm9, %v1252_v13, %v1284_v0 }
 0xd62   :  { %1467 = vmatmul.msk.f32.gmra.mxu0 %vm130_vm0, %v1300_v34 }
 0xd64   :  { %v1357_v37 = vpop.f32.mrf.mxu0 }
 0xd65   :  { %v1358_v54 = vadd.f32 %v1497_v30, %v1357_v37 }
 0xd67   :  { %1379 = vst [vmem:[#allocation14 + $0x8] sm:$0xff] %v1358_v54 }
 0xd6c   :  { %v1360_v59 = vpop.f32.mrf.mxu0 }
 0xd6d   :  { %v1361_v60 = vadd.f32 %v1497_v30, %v1360_v59 }
 0xd6f   :  { %1380 = vst [vmem:[#allocation14 + $0x10] sm:$0xff] %v1361_v60 }
 0xd74   :  { %v1363_v61 = vpop.f32.mrf.mxu0 }
 0xd75   :  { %v1364_v62 = vadd.f32 %v1497_v30, %v1363_v61 }
 0xd77   :  { %1381 = vst [vmem:[#allocation14 + $0x18] sm:$0xff] %v1364_v62 }
 0xd7c   :  { %v1366_v1 = vpop.f32.mrf.mxu0 }
 0xd7d   :  { %v1367_v2 = vadd.f32 %v1497_v30, %v1366_v1 }
 0xd7f   :  { %1382 = vst [vmem:[#allocation14 + $0x20] sm:$0xff] %v1367_v2 }
 0xd84   :  { %v1369_v21 = vpop.f32.mrf.mxu0 }
 0xd85   :  { %v1370_v28 = vadd.f32 %v1497_v30, %v1369_v21 }
 0xd87   :  { %1383 = vst [vmem:[#allocation14 + $0x28] sm:$0xff] %v1370_v28 }
 0xd8c   :  { %v1372_v8 = vpop.f32.mrf.mxu0 }
 0xd8d   :  { %v1373_v57 = vadd.f32 %v1497_v30, %v1372_v8 }
 0xd8f   :  { %1384 = vst [vmem:[#allocation14 + $0x30] sm:$0xff] %v1373_v57 }
 0xddf   :  { %v1375_v49 = vpop.f32.mrf.mxu0 }
 0xde0   :  { %v1376_v10 = vadd.f32 %v1497_v30, %v1375_v49 }
 0xde2   :  { %1385 = vst [vmem:[#allocation14 + $0x38] sm:$0xff] %v1376_v10 }
 0xde3   :  { %1398 = dma.vmem_to_hbm [thread:$0]  %s1391_s25, 1024, %s1393_s28, [#allocation7], %s1751_s15, %s1751_s15, %s1752_s16  }
 0xde4   :  { %1744 = dma.done.wait [#allocation7], 1024  }
 0xde5   :  { %1745 = vsyncadd [#allocation7], 4294966272 }
 0xde6   :  { %1403 = vsyncpa [#allocation6], 1 }
 0xde7   :  { %1404 = vsyncpa [#allocation9], 1 }
 0xde8   :  { %1405 = vsyncpa [#allocation12], 1 }
 0xde9   :  { %1406 = vsyncpa [#allocation7], 1 }

</bundles_post_ra>
